<compile_context>
chip_gen: v6e
topology: v6e:2x2x1
jax: 0.10.0
libtpu: 0.0.40
codegen_flags: <defaults>
</compile_context>

<pallas_src>
import functools

import jax
import jax.numpy as jnp
import numpy as np
from jax.experimental import pallas as pl
from jax.experimental.pallas import tpu as pltpu


def _round_up(x, m):
    return (x + m - 1) // m * m


def _largest_divisor_leq(n, cap):
    cap = max(1, min(cap, n))
    for c in range(cap, 0, -1):
        if n % c == 0:
            return c
    return 1


def _conv_bn_silu_kernel(x_ref, w_ref, scale_ref, bias_ref, o_ref,
                         *, k, s, d, tile_ho, Wo):
    """One grid step = one output-row tile of one batch element.

    x_ref:     (1, Hp, Wp, C1)        padded bf16 NHWC image (shared across t)
    w_ref:     (k*k*C1, C2p)          fused im2col conv weight (bf16)
    scale_ref: (1, C2p)               folded BN scale  (gamma / sqrt(var+eps))
    bias_ref:  (1, C2p)               folded BN bias   (beta - mean * scale)
    o_ref:     (1, tile_ho*Wo, C2p)   lane-dense output row tile (f32)
    """
    t = pl.program_id(1)
    c1 = x_ref.shape[-1]
    h_start = pl.multiple_of(t * (tile_ho * s), tile_ho * s)

    # Build the im2col patch: concatenate the k*k taps along the channel axis
    # ONCE, then do a single MXU matmul with contraction depth k*k*C1.
    cols = []
    if s == 1:
        # Direct windowed ref reads (no strided value slices / relayouts).
        for kh in range(k):
            for kw in range(k):
                patch = x_ref[0,
                              pl.ds(h_start + kh * d, tile_ho),
                              pl.ds(kw * d, Wo),
                              :]                                  # (tile_ho, Wo, C1)
                cols.append(patch.reshape(tile_ho * Wo, c1))
    else:
        # General strided path: read the row window once, strided-slice taps.
        rows_in = (tile_ho - 1) * s + d * (k - 1) + 1
        xt = x_ref[0, pl.ds(h_start, rows_in), :, :]              # (rows_in, Wp, C1)
        for kh in range(k):
            for kw in range(k):
                patch = jax.lax.slice(
                    xt,
                    (kh * d, kw * d, 0),
                    (kh * d + (tile_ho - 1) * s + 1,
                     kw * d + (Wo - 1) * s + 1,
                     c1),
                    (s, s, 1),
                )                                                 # (tile_ho, Wo, C1)
                cols.append(patch.reshape(tile_ho * Wo, c1))

    lhs = jnp.concatenate(cols, axis=-1) if len(cols) > 1 else cols[0]

    # Single fused matmul: bf16 inputs, f32 accumulation.
    acc = jnp.dot(lhs, w_ref[...], preferred_element_type=jnp.float32)

    # Fused eval-mode BatchNorm (folded) + SiLU.
    y = acc * scale_ref[...] + bias_ref[...]
    y = y * jax.nn.sigmoid(y)

    o_ref[0] = y.astype(o_ref.dtype)


def conv_bn_silu(x_nchw, w_oihw, gamma, beta, run_mean, run_var,
                 *, k, s=1, p=0, d=1, eps=1e-5, tile_ho=None):
    N, C1, H, W = x_nchw.shape
    C2 = w_oihw.shape[0]
    out_dtype = x_nchw.dtype

    # NCHW -> NHWC, spatial zero-pad, cast to bf16 (halves activation bytes
    # and feeds the MXU at its bf16 peak).  Transpose+pad fuse into the one
    # relayout pass we already need for NHWC.
    x = jnp.transpose(x_nchw, (0, 2, 3, 1))
    if p:
        x = jnp.pad(x, ((0, 0), (p, p), (p, p), (0, 0)))
    x = x.astype(jnp.bfloat16)
    Hp, Wp = H + 2 * p, W + 2 * p
    Ho = (Hp - d * (k - 1) - 1) // s + 1
    Wo = (Wp - d * (k - 1) - 1) // s + 1

    # Lane-dense output channels: pad C2 up to a multiple of 128.
    C2p = _round_up(C2, 128)

    # Fused im2col weight: OIHW -> (kh, kw, Cin, Cout) -> (k*k*Cin, C2p), bf16.
    # Row order (kh*k + kw)*C1 + cin matches the kernel's tap-concat order.
    w = jnp.transpose(w_oihw, (2, 3, 1, 0)).reshape(k * k * C1, C2)
    w = jnp.pad(w, ((0, 0), (0, C2p - C2))).astype(jnp.bfloat16)

    # Folded eval-mode BatchNorm -> per-channel scale/bias (f32, zero-padded
    # channels stay exactly zero through SiLU and are sliced off below).
    inv_std = 1.0 / jnp.sqrt(run_var + eps)
    scale = jnp.pad(gamma * inv_std, (0, C2p - C2)).reshape(1, C2p).astype(jnp.float32)
    bias = jnp.pad(beta - run_mean * gamma * inv_std,
                   (0, C2p - C2)).reshape(1, C2p).astype(jnp.float32)

    # Output-row tiling: bounds the accumulator and pipelines output DMA.
    if tile_ho is None:
        tile_ho = _largest_divisor_leq(Ho, max(1, 512 // max(Wo, 1)))
    else:
        tile_ho = _largest_divisor_leq(Ho, tile_ho)
    T = Ho // tile_ho

    kernel = functools.partial(_conv_bn_silu_kernel,
                               k=k, s=s, d=d, tile_ho=tile_ho, Wo=Wo)

    out2d = pl.pallas_call(
        kernel,
        out_shape=jax.ShapeDtypeStruct((N, Ho * Wo, C2p), out_dtype),
        grid_spec=pltpu.PrefetchScalarGridSpec(
            num_scalar_prefetch=0,
            grid=(N, T),
            in_specs=[
                # Full padded image per batch element; block index depends only
                # on n, so it is fetched once and re-used across row tiles.
                pl.BlockSpec((1, Hp, Wp, C1), lambda n, t: (n, 0, 0, 0)),
                pl.BlockSpec((k * k * C1, C2p), lambda n, t: (0, 0)),
                pl.BlockSpec((1, C2p), lambda n, t: (0, 0)),
                pl.BlockSpec((1, C2p), lambda n, t: (0, 0)),
            ],
            out_specs=pl.BlockSpec((1, tile_ho * Wo, C2p),
                                   lambda n, t: (n, t, 0)),
        ),
        compiler_params=pltpu.CompilerParams(
            dimension_semantics=("parallel", "parallel")),
    )(x, w, scale, bias)

    out = out2d.reshape(N, Ho, Wo, C2p)[..., :C2]
    return jnp.transpose(out, (0, 3, 1, 2))  # back to NCHW


def _reference(x_nchw, w_oihw, gamma, beta, run_mean, run_var,
               *, k, s, p, d, eps=1e-5):
    y = jax.lax.conv_general_dilated(
        x_nchw, w_oihw,
        window_strides=(s, s),
        padding=((p, p), (p, p)),
        rhs_dilation=(d, d),
        dimension_numbers=("NCHW", "OIHW", "NCHW"),
    )
    inv_std = 1.0 / jnp.sqrt(run_var + eps)
    scale = (gamma * inv_std)[None, :, None, None]
    bias = (beta - run_mean * gamma * inv_std)[None, :, None, None]
    y = y * scale + bias
    return y * jax.nn.sigmoid(y)


def _check(out, x, w, gamma, beta, run_mean, run_var, *, k, s, p, d):
    # Semantic check vs full-f32 reference (loose: kernel uses bf16 inputs).
    ref_f32 = _reference(x, w, gamma, beta, run_mean, run_var, k=k, s=s, p=p, d=d)
    np.testing.assert_allclose(np.asarray(out), np.asarray(ref_f32),
                               atol=5e-2, rtol=5e-2)
    # Tight check vs reference computed on bf16-quantized inputs (isolates
    # the kernel's math from the input quantization).
    xq = x.astype(jnp.bfloat16).astype(jnp.float32)
    wq = w.astype(jnp.bfloat16).astype(jnp.float32)
    ref_q = _reference(xq, wq, gamma, beta, run_mean, run_var, k=k, s=s, p=p, d=d)
    np.testing.assert_allclose(np.asarray(out), np.asarray(ref_q),
                               atol=1e-3, rtol=1e-3)


if __name__ == "__main__":
    N, C1, H, W = 2, 4, 16, 16
    C2 = 8

    key = jax.random.PRNGKey(0)
    kx, kw3, kw1, kg, kb, km, kv = jax.random.split(key, 7)

    x = jax.random.normal(kx, (N, C1, H, W), jnp.float32)
    # Synthetic (deterministic) eval-mode BN parameters / running stats.
    gamma = 0.5 + jax.random.uniform(kg, (C2,), jnp.float32)
    beta = 0.1 * jax.random.normal(kb, (C2,), jnp.float32)
    run_mean = 0.1 * jax.random.normal(km, (C2,), jnp.float32)
    run_var = 0.5 + jax.random.uniform(kv, (C2,), jnp.float32)

    # Conv(c1=4, c2=8, k=3, p=1, s=1, act='silu', norm='BN') -- 3x3 path.
    K, P, S, D = 3, 1, 1, 1
    w3 = jax.random.normal(kw3, (C2, C1, K, K), jnp.float32) * np.sqrt(2.0 / (C1 * K * K))
    out3 = conv_bn_silu(x, w3, gamma, beta, run_mean, run_var,
                        k=K, s=S, p=P, d=D, tile_ho=8)   # tile_ho=8 -> 2 row tiles
    out3 = jax.block_until_ready(out3)
    _check(out3, x, w3, gamma, beta, run_mean, run_var, k=K, s=S, p=P, d=D)

    # Conv(c1=4, c2=8, k=1, p=0, s=1) -- pointwise path.
    w1 = jax.random.normal(kw1, (C2, C1, 1, 1), jnp.float32) * np.sqrt(2.0 / C1)
    out1 = conv_bn_silu(x, w1, gamma, beta, run_mean, run_var,
                        k=1, s=1, p=0, d=1, tile_ho=8)
    out1 = jax.block_until_ready(out1)
    _check(out1, x, w1, gamma, beta, run_mean, run_var, k=1, s=1, p=0, d=1)

    print("KERNEL_OK")
</pallas_src>

<mosaic_0001>
module attributes {stable_mosaic.version = 11 : i64} {
  func.func @_conv_bn_silu_kernel(%arg0: i32, %arg1: i32, %arg2: memref<1x18x18x4xbf16, #tpu.memory_space<vmem>>, %arg3: memref<36x128xbf16, #tpu.memory_space<vmem>>, %arg4: memref<1x128xf32, #tpu.memory_space<vmem>>, %arg5: memref<1x128xf32, #tpu.memory_space<vmem>>, %arg6: memref<1x128x128xf32, #tpu.memory_space<vmem>>) attributes {dimension_semantics = [#tpu.dimension_semantics<parallel>, #tpu.dimension_semantics<parallel>], iteration_bounds = array<i64: 2, 2>, scalar_prefetch = 0 : i64, scratch_operands = 0 : i64, tpu.core_type = #tpu.core_type<tc>, window_params = [{transform_indices = @transform_0, window_bounds = array<i64: 1, 18, 18, 4>}, {pipeline_mode = #tpu.pipeline_mode<synchronous>, transform_indices = @transform_1, window_bounds = array<i64: 36, 128>}, {pipeline_mode = #tpu.pipeline_mode<synchronous>, transform_indices = @transform_2, window_bounds = array<i64: 1, 128>}, {pipeline_mode = #tpu.pipeline_mode<synchronous>, transform_indices = @transform_3, window_bounds = array<i64: 1, 128>}, {transform_indices = @transform_4, window_bounds = array<i64: 1, 128, 128>}]} {
    %c8_i32 = arith.constant 8 : i32
    %0 = arith.muli %arg1, %c8_i32 : i32
    %1 = tpu.assume_multiple %0, 8 : i32
    %c0_i32 = arith.constant 0 : i32
    %2 = arith.addi %1, %c0_i32 : i32
    %c0 = arith.constant 0 : index
    %3 = arith.index_cast %2 : i32 to index
    %c0_0 = arith.constant 0 : index
    %c0_1 = arith.constant 0 : index
    %4 = vector.load %arg2[%c0, %3, %c0_0, %c0_1] : memref<1x18x18x4xbf16, #tpu.memory_space<vmem>>, vector<1x8x16x4xbf16>
    %5 = vector.shape_cast %4 : vector<1x8x16x4xbf16> to vector<8x16x4xbf16>
    %6 = vector.shape_cast %5 : vector<8x16x4xbf16> to vector<128x4xbf16>
    %c0_i32_2 = arith.constant 0 : i32
    %7 = arith.addi %1, %c0_i32_2 : i32
    %c0_3 = arith.constant 0 : index
    %8 = arith.index_cast %7 : i32 to index
    %c1 = arith.constant 1 : index
    %c0_4 = arith.constant 0 : index
    %9 = vector.load %arg2[%c0_3, %8, %c1, %c0_4] : memref<1x18x18x4xbf16, #tpu.memory_space<vmem>>, vector<1x8x16x4xbf16>
    %10 = vector.shape_cast %9 : vector<1x8x16x4xbf16> to vector<8x16x4xbf16>
    %11 = vector.shape_cast %10 : vector<8x16x4xbf16> to vector<128x4xbf16>
    %c0_i32_5 = arith.constant 0 : i32
    %12 = arith.addi %1, %c0_i32_5 : i32
    %c0_6 = arith.constant 0 : index
    %13 = arith.index_cast %12 : i32 to index
    %c2 = arith.constant 2 : index
    %c0_7 = arith.constant 0 : index
    %14 = vector.load %arg2[%c0_6, %13, %c2, %c0_7] : memref<1x18x18x4xbf16, #tpu.memory_space<vmem>>, vector<1x8x16x4xbf16>
    %15 = vector.shape_cast %14 : vector<1x8x16x4xbf16> to vector<8x16x4xbf16>
    %16 = vector.shape_cast %15 : vector<8x16x4xbf16> to vector<128x4xbf16>
    %c1_i32 = arith.constant 1 : i32
    %17 = arith.addi %1, %c1_i32 : i32
    %c0_8 = arith.constant 0 : index
    %18 = arith.index_cast %17 : i32 to index
    %c0_9 = arith.constant 0 : index
    %c0_10 = arith.constant 0 : index
    %19 = vector.load %arg2[%c0_8, %18, %c0_9, %c0_10] : memref<1x18x18x4xbf16, #tpu.memory_space<vmem>>, vector<1x8x16x4xbf16>
    %20 = vector.shape_cast %19 : vector<1x8x16x4xbf16> to vector<8x16x4xbf16>
    %21 = vector.shape_cast %20 : vector<8x16x4xbf16> to vector<128x4xbf16>
    %c1_i32_11 = arith.constant 1 : i32
    %22 = arith.addi %1, %c1_i32_11 : i32
    %c0_12 = arith.constant 0 : index
    %23 = arith.index_cast %22 : i32 to index
    %c1_13 = arith.constant 1 : index
    %c0_14 = arith.constant 0 : index
    %24 = vector.load %arg2[%c0_12, %23, %c1_13, %c0_14] : memref<1x18x18x4xbf16, #tpu.memory_space<vmem>>, vector<1x8x16x4xbf16>
    %25 = vector.shape_cast %24 : vector<1x8x16x4xbf16> to vector<8x16x4xbf16>
    %26 = vector.shape_cast %25 : vector<8x16x4xbf16> to vector<128x4xbf16>
    %c1_i32_15 = arith.constant 1 : i32
    %27 = arith.addi %1, %c1_i32_15 : i32
    %c0_16 = arith.constant 0 : index
    %28 = arith.index_cast %27 : i32 to index
    %c2_17 = arith.constant 2 : index
    %c0_18 = arith.constant 0 : index
    %29 = vector.load %arg2[%c0_16, %28, %c2_17, %c0_18] : memref<1x18x18x4xbf16, #tpu.memory_space<vmem>>, vector<1x8x16x4xbf16>
    %30 = vector.shape_cast %29 : vector<1x8x16x4xbf16> to vector<8x16x4xbf16>
    %31 = vector.shape_cast %30 : vector<8x16x4xbf16> to vector<128x4xbf16>
    %c2_i32 = arith.constant 2 : i32
    %32 = arith.addi %1, %c2_i32 : i32
    %c0_19 = arith.constant 0 : index
    %33 = arith.index_cast %32 : i32 to index
    %c0_20 = arith.constant 0 : index
    %c0_21 = arith.constant 0 : index
    %34 = vector.load %arg2[%c0_19, %33, %c0_20, %c0_21] : memref<1x18x18x4xbf16, #tpu.memory_space<vmem>>, vector<1x8x16x4xbf16>
    %35 = vector.shape_cast %34 : vector<1x8x16x4xbf16> to vector<8x16x4xbf16>
    %36 = vector.shape_cast %35 : vector<8x16x4xbf16> to vector<128x4xbf16>
    %c2_i32_22 = arith.constant 2 : i32
    %37 = arith.addi %1, %c2_i32_22 : i32
    %c0_23 = arith.constant 0 : index
    %38 = arith.index_cast %37 : i32 to index
    %c1_24 = arith.constant 1 : index
    %c0_25 = arith.constant 0 : index
    %39 = vector.load %arg2[%c0_23, %38, %c1_24, %c0_25] : memref<1x18x18x4xbf16, #tpu.memory_space<vmem>>, vector<1x8x16x4xbf16>
    %40 = vector.shape_cast %39 : vector<1x8x16x4xbf16> to vector<8x16x4xbf16>
    %41 = vector.shape_cast %40 : vector<8x16x4xbf16> to vector<128x4xbf16>
    %c2_i32_26 = arith.constant 2 : i32
    %42 = arith.addi %1, %c2_i32_26 : i32
    %c0_27 = arith.constant 0 : index
    %43 = arith.index_cast %42 : i32 to index
    %c2_28 = arith.constant 2 : index
    %c0_29 = arith.constant 0 : index
    %44 = vector.load %arg2[%c0_27, %43, %c2_28, %c0_29] : memref<1x18x18x4xbf16, #tpu.memory_space<vmem>>, vector<1x8x16x4xbf16>
    %45 = vector.shape_cast %44 : vector<1x8x16x4xbf16> to vector<8x16x4xbf16>
    %46 = vector.shape_cast %45 : vector<8x16x4xbf16> to vector<128x4xbf16>
    %47 = tpu.concatenate %6, %11, %16, %21, %26, %31, %36, %41, %46 in 1 : vector<128x4xbf16>, vector<128x4xbf16>, vector<128x4xbf16>, vector<128x4xbf16>, vector<128x4xbf16>, vector<128x4xbf16>, vector<128x4xbf16>, vector<128x4xbf16>, vector<128x4xbf16> -> vector<128x36xbf16>
    %c0_30 = arith.constant 0 : index
    %c0_31 = arith.constant 0 : index
    %48 = vector.load %arg3[%c0_30, %c0_31] : memref<36x128xbf16, #tpu.memory_space<vmem>>, vector<36x128xbf16>
    %cst = arith.constant dense<0.000000e+00> : vector<128x128xf32>
    %49 = tpu.matmul %47, %48, %cst {dimension_numbers = #tpu.dot_dimension_numbers<[1], [0], [0], [1], [0, 0, 1, 1], [], []>} : vector<128x36xbf16>, vector<36x128xbf16>, vector<128x128xf32> -> vector<128x128xf32>
    %c0_32 = arith.constant 0 : index
    %c0_33 = arith.constant 0 : index
    %50 = vector.load %arg4[%c0_32, %c0_33] : memref<1x128xf32, #tpu.memory_space<vmem>>, vector<1x128xf32>
    %51 = vector.broadcast %50 : vector<1x128xf32> to vector<128x128xf32>
    %52 = arith.mulf %49, %51 : vector<128x128xf32>
    %c0_34 = arith.constant 0 : index
    %c0_35 = arith.constant 0 : index
    %53 = vector.load %arg5[%c0_34, %c0_35] : memref<1x128xf32, #tpu.memory_space<vmem>>, vector<1x128xf32>
    %54 = vector.broadcast %53 : vector<1x128xf32> to vector<128x128xf32>
    %55 = arith.addf %52, %54 : vector<128x128xf32>
    %56 = arith.negf %55 : vector<128x128xf32>
    %57 = math.exp %56 : vector<128x128xf32>
    %cst_36 = arith.constant 1.000000e+00 : f32
    %58 = vector.broadcast %cst_36 : f32 to vector<128x128xf32>
    %59 = arith.addf %58, %57 : vector<128x128xf32>
    %60 = arith.divf %58, %59 : vector<128x128xf32>
    %61 = arith.mulf %55, %60 : vector<128x128xf32>
    %c0_37 = arith.constant 0 : index
    %c0_38 = arith.constant 0 : index
    %c0_39 = arith.constant 0 : index
    %62 = vector.load %arg6[%c0_37, %c0_38, %c0_39] : memref<1x128x128xf32, #tpu.memory_space<vmem>>, vector<1x128x128xf32>
    %63 = vector.shape_cast %62 : vector<1x128x128xf32> to vector<128x128xf32>
    %64 = vector.shape_cast %61 : vector<128x128xf32> to vector<1x128x128xf32>
    tpu.vector_store %arg6[%c0_37, %c0_38, %c0_39], %64 {strides = array<i32>} : memref<1x128x128xf32, #tpu.memory_space<vmem>>, vector<1x128x128xf32>,
    return
  }
  func.func @transform_0(%arg0: i32, %arg1: i32) -> (i32, i32, i32, i32) {
    %c0_i32 = arith.constant 0 : i32
    %c0_i32_0 = arith.constant 0 : i32
    %c0_i32_1 = arith.constant 0 : i32
    %c0_i32_2 = arith.constant 0 : i32
    return %arg0, %c0_i32, %c0_i32_0, %c0_i32_1 : i32, i32, i32, i32
  }
  func.func @transform_1(%arg0: i32, %arg1: i32) -> (i32, i32) {
    %c0_i32 = arith.constant 0 : i32
    %c0_i32_0 = arith.constant 0 : i32
    %c0_i32_1 = arith.constant 0 : i32
    return %c0_i32, %c0_i32_0 : i32, i32
  }
  func.func @transform_2(%arg0: i32, %arg1: i32) -> (i32, i32) {
    %c0_i32 = arith.constant 0 : i32
    %c0_i32_0 = arith.constant 0 : i32
    %c0_i32_1 = arith.constant 0 : i32
    return %c0_i32, %c0_i32_0 : i32, i32
  }
  func.func @transform_3(%arg0: i32, %arg1: i32) -> (i32, i32) {
    %c0_i32 = arith.constant 0 : i32
    %c0_i32_0 = arith.constant 0 : i32
    %c0_i32_1 = arith.constant 0 : i32
    return %c0_i32, %c0_i32_0 : i32, i32
  }
  func.func @transform_4(%arg0: i32, %arg1: i32) -> (i32, i32, i32) {
    %c0_i32 = arith.constant 0 : i32
    %c0_i32_0 = arith.constant 0 : i32
    return %arg0, %arg1, %c0_i32 : i32, i32, i32
  }
}

</mosaic_0001>

<bundles_post_ra>
// kernel: tpu_custom_call.1
= control target key start
LH: loop header
LB: loop body
LE: loop exit
PB: predicated region body
PF: predicated region fallthrough
CT: control target
= control target key end

     0   :  { %9 = vsyncpa [#allocation3], 0  ;;  %s3666_s0 = inlined_call_operand.vmem [shape: bf16[2,18,18,4], index: 0, kind: input, shape index: {}]   ;;  %s3667_s1 = inlined_call_operand.vmem [shape: bf16[36,128], index: 1, kind: input, shape index: {}]   ;;  %s3668_s2 = inlined_call_operand.vmem [shape: f32[1,128], index: 2, kind: input, shape index: {}]   ;;  %s3669_s3 = inlined_call_operand.vmem [shape: f32[1,128], index: 3, kind: input, shape index: {}]   ;;  %s3670_s4 = inlined_call_operand.hbm [shape: f32[2,256,128], index: 4, kind: output, shape index: {}]  }
   0x1   :  { %11 = vsyncpa [#allocation3 + $0x1], 0  ;;  %s2632_s15 = smov 0   ;;  %s2634_s16 = smov 0  }
   0x2   :  { %s2636_s17 = smov 0   ;;  %s2638_s18 = smov 0  }
   0x3   :  { %s2640_s19 = smov 0   ;;  %s2642_s20 = smov 0  }
   0x4   :  { %s2644_s21 = smov 0   ;;  %s2646_s22 = smov 0  }
   0x5 LB: > { %s2068_s23 = sadd.s32 4294967295, %s2595_s22   ;;  %s2069_s24 = sadd.s32 4294967294, %s2595_s22   ;;  %s2595_s22 = sphi %s2646_s22, %s17_s22   ;;  %s2591_s21 = sphi %s2644_s21, %s3683_s21   ;;  %s2587_s20 = sphi %s2642_s20, %s3682_s20   ;;  %s2583_s19 = sphi %s2640_s19, %s3681_s19   ;;  %s2579_s18 = sphi %s2638_s18, %s3680_s18   ;;  %s2575_s17 = sphi %s2636_s17, %s3679_s17   ;;  %s2571_s16 = sphi %s2634_s16, %s3678_s16   ;;  %s2567_s15 = sphi %s2632_s15, %s3677_s15  }
   0x6   : > { %s26_s25 = sadd.s32 1, %s2587_s20  ;;  %s29_s26 = sadd.s32 1, %s2591_s21 }
   0x7   : > { %p27_p0 = scmp.ge.s32.totalorder %s26_s25, 2  ;;  %p137_p1 = scmp.ne.s32.totalorder %s2575_s17, %s2571_s16 }
   0x8   : > { %p138_p2 = scmp.eq.s32.totalorder %s2068_s23, 3  ;;  %p143_p5 = scmp.ne.s32.totalorder %s2571_s16, %s2567_s15 }
   0x9   : > { %s3685_s25 = smov (%p27_p0, %s26_s25), 0  ;;  %s3687_s26 = smov (!%p27_p0, %s29_s26), %s2591_s21 }
   0xa   : > { %s123_s27 = ssub.s32 %s2587_s20, %s3685_s25  ;;  %p2683_p3 = por %p138_p2, %p137_p1 }
   0xb   : > { %p31_p4 = scmp.ge.s32.totalorder %s3687_s26, 2  ;;  %p144_p6 = scmp.eq.s32.totalorder %s2069_s24, 3 }
   0xc   : > { %p2072_p7 = scmp.ge.s32.totalorder %s2595_s22, 1  ;;  %p179_p9 = scmp.lt.s32.totalorder %s2595_s22, 5 }
   0xd   : > { %s3689_s26 = smov (%p31_p4, %s3687_s26), 0  ;;  %p2692_p8 = por %p144_p6, %p143_p5 }
   0xe   : > { %s122_s30 = ssub.s32 %s2591_s21, %s3689_s26  ;;  %s127_s5 = sadd.s32 1, %s2575_s17 }
   0xf   : > { %s124_s6 = sor.u32 %s123_s27, %s122_s30  ;;  %p180_p10 = pnand %p2072_p7, %p179_p9 }
  0x10   : > { %p125_p11 = scmp.eq.s32.totalorder %s124_s6, 0  ;;  %p205_p12 = scmp.lt.s32.totalorder (!%p180_p10), %s2583_s19, 1 }
  0x11   : > { %183 = sbr.rel (%p180_p10) target bundleno = 551 (0x227), region = 36  ;;  %s2597_s23 = smov (!%p180_p10), 12  }
  0x12   : > { %s2701_s7 = scalar_select %p125_p11, %s2575_s17, %s127_s5  }
  0x13   : > { %s2277_s9 = smul.u32 (!%p180_p10), 96, %s2579_s18  ;;  %s2598_s24 = smov (!%p180_p10), 8  }
  0x14   : > { %s2599_s27 = smov (!%p180_p10), 4   ;;  %s2600_s30 = smov (!%p180_p10), 16  }
  0x15   : > { %s2601_s5 = smov (!%p180_p10), 20   ;;  %s2602_s6 = smov (!%p180_p10), 24  }
  0x16   : > { %s206_s8 = scalar_select %p205_p12, %s2583_s19, 1  ;;  %vm467_vm0 = vcmask 1042432   ;;  %vm468_vm1 = vcmask 1046532   ;;  %vm240_vm3 = vsmask.f32 3328  ;;  %vm1691_vm6 = vcmask 1041408  }
  0x17   : > { %vm2757_vm2 = vmor %vm467_vm0, %vm468_vm1  ;;  %vm241_vm4 = vsmask.f32 7440  ;;  %v2424_v39 = vld [vmem:[%s3667_s1] sm:$0xff]   ;;  %vm1510_vm7 = vcmask 31744   ;;  %vm1535_vm8 = vcmask 64512   ;;  %vm1552_vm9 = vcmask 97280  }
  0x18   : > { %s2319_s10 = smul.u32 216, %s206_s8  ;;  %vm2823_vm5 = vmor %vm240_vm3, %vm241_vm4  ;;  %s2603_s8 = smov 28   ;;  %vm1569_vm10 = vcmask 130048   ;;  %vm1586_vm11 = vcmask 162816   ;;  %vm1603_vm12 = vcmask 195584   ;;  %vm1620_vm13 = vcmask 228352  }
  0x19   : > { %vm1637_vm14 = vcmask 261120   ;;  %vm1674_vm15 = vcmask 293888   ;;  %s2272_s11 = sshll.u32 %s2579_s18, 4  ;;  %s2273_s12 = sshll.u32 %s2583_s19, 5 }
  0x1a   : > { %s209_s13 = scalar_lea.vmem %s3666_s0, %s2319_s10 }
  0x1b   : > { %s2709_s14 = scalar_lea.vmem %s209_s13, %s2277_s9  ;;  %s2604_s9 = smov 32  }
  0x1c   : > { %v2096_v0 = vld [vmem:[%s2709_s14 + $0x3c] sm:$0xf]  ;;  %v2713_v1 = vld [vmem:[%s2709_s14 + $0x40] sm:$0xf]  ;;  %v2088_v2 = vld [vmem:[%s2709_s14 + $0xc] sm:$0xf]  ;;  %s1979_s13 = sadd.s32 %s2273_s12, %s2272_s11 }
  0x1d   : > { %v660_v3 = vshll.u32 %v2713_v1, 16  ;;  %v664_v4 = vshrl.u32 %v2713_v1, 16  ;;  %v2198_v5 = vcombine.low %v2096_v0, %v2713_v1  ;;  %v651_v6 = vshrl.u32 %v2096_v0, 16  ;;  %v2720_v7 = vld [vmem:[%s2709_s14 + $0x10] sm:$0xf]  ;;  %s2274_s18 = sshll.u32 %s1979_s13, 7 }
  0x1e   : > { %v654_v8 = vshll.u32 %v2096_v0, 16  ;;  %v564_v9 = vshll.u32 %v2720_v7, 16  ;;  %v568_v10 = vshrl.u32 %v2720_v7, 16  ;;  %v2194_v11 = vcombine.low %v2088_v2, %v2720_v7  ;;  %v2098_v12 = vld [vmem:[%s2709_s14 + $0x48] sm:$0xf] }
  0x1f   : > { %v2726_v13 = vrot.slane %v664_v4, 4  ;;  %1294 = vrot.lane.b32.xlu1 %v2198_v5, %s2597_s23  ;;  %v653_v14 = vrot.slane %v651_v6, 4  ;;  %v555_v15 = vshrl.u32 %v2088_v2, 16  ;;  %v558_v16 = vshll.u32 %v2088_v2, 16  ;;  %v2730_v17 = vld [vmem:[%s2709_s14 + $0x4c] sm:$0xf] }
  0x20   : > { %v656_v18 = vrot.slane %v654_v8, 5  ;;  %v2732_v19 = vrot.slane %v568_v10, 4  ;;  %1286 = vrot.lane.b32.xlu0 %v2194_v11, %s2597_s23  ;;  %v675_v20 = vshrl.u32 %v2098_v12, 16  ;;  %v678_v21 = vshll.u32 %v2098_v12, 16  ;;  %v2090_v22 = vld [vmem:[%s2709_s14 + $0x18] sm:$0xf] }
  0x21   : > { %v557_v23 = vrot.slane %v555_v15, 4  ;;  %v560_v24 = vrot.slane %v558_v16, 5  ;;  %v688_v25 = vshrl.u32 %v2730_v17, 16  ;;  %v2199_v26 = vcombine.low %v2098_v12, %v2730_v17  ;;  %v2739_v27 = vld [vmem:[%s2709_s14 + $0x1c] sm:$0xf] }
  0x22   : > { %v657_v28 = vor.u32 %v656_v18, %v653_v14  ;;  %v2741_v29 = vrot.slane %v675_v20, 4  ;;  %v2743_v30 = vrot.slane %v678_v21, 5  ;;  %v579_v31 = vshrl.u32 %v2090_v22, 16  ;;  %v2746_v32 = vld [vmem:[%s2709_s14 + $0x34] sm:$0xf] }
  0x23   : > { %v561_v33 = vor.u32 %v560_v24, %v557_v23  ;;  %1296 = vrot.lane.b32.xlu1 %v2199_v26, %s2597_s23  ;;  %v582_v34 = vshll.u32 %v2090_v22, 16  ;;  %v592_v35 = vshrl.u32 %v2739_v27, 16  ;;  %v2195_v36 = vcombine.low %v2090_v22, %v2739_v27  ;;  %v2752_v37 = vld [vmem:[%s2709_s14 + $0x38] sm:$0x1]  ;;  %v439_v38 = vld [vmem:[%s2709_s14 + $0x30] sm:$0xe] }
  0x24   : > { %v2761_v40 = vrot.slane %v657_v28, 4  ;;  %v2763_v41 = vrot.slane %v579_v31, 4  ;;  %v2082_v42 = vrot.slane %v439_v38, 9  ;;  %v500_v43 = vrot.slane %v2746_v32, 5  ;;  %v2767_v44 = vld [vmem:[%s2709_s14 + $0x4] sm:$0xf] }
  0x25   : > { %v2769_v45 = vrot.slane %v561_v33, 4  ;;  %v2771_v46 = vrot.slane %v582_v34, 5  ;;  %1288 = vrot.lane.b32.xlu0 %v2195_v36, %s2597_s23  ;;  %v503_v47 = vrot.slane %v2752_v37, 5  ;;  %v2776_v48 = vld [vmem:[%s2709_s14 + $0x8] sm:$0x1]  ;;  %v472_v49 = vrot.slane %v2767_v44, 5 }
  0x26   : > { %v501_v50 = vsel %vm2757_vm2, %v2082_v42, %v500_v43  ;;  %v502_v51 = vrot.slane %v500_v43, 4  ;;  %v435_v52 = vld [vmem:[%s2709_s14] sm:$0xe]  ;;  %v475_v53 = vrot.slane %v2776_v48, 5  ;;  %v2787_v57 = vld [vmem:[%s2709_s14 + $0x44] sm:$0x1]  ;;  %v681_v59 = vor.u32 %v2743_v30, %v2741_v29 }
  0x27   : > { %v2784_v54 = vld [vmem:[%s2709_s14 + $0x40] sm:$0xf]  ;;  %v2078_v55 = vrot.slane %v435_v52, 9  ;;  %v474_v56 = vrot.slane %v472_v49, 4  ;;  %v440_v58 = vld [vmem:[%s2709_s14 + $0x3c] sm:$0xe]  ;;  %v585_v60 = vor.u32 %v2771_v46, %v2763_v41 }
  0x28   : > { %v504_v61 = vsel %vm2757_vm2, %v502_v51, %v503_v47  ;;  %v2083_v62 = vrot.slane %v440_v58, 9  ;;  %v507_v63 = vrot.slane %v2784_v54, 5  ;;  %v510_v0 = vrot.slane %v2787_v57, 5  ;;  %v219_v2 = vld [vmem:[%s2709_s14 + $0x10] sm:$0xf] }
  0x29   : > { %v2190_v4 = vcombine.low %v501_v50, %v504_v61  ;;  %v473_v5 = vsel %vm2757_vm2, %v2078_v55, %v472_v49  ;;  %v476_v6 = vsel %vm2757_vm2, %v474_v56, %v475_v53  ;;  %v233_v8 = vld [vmem:[%s2709_s14 + $0x14] sm:$0x1]  ;;  %v436_v10 = vld [vmem:[%s2709_s14 + $0xc] sm:$0xe]  ;;  %v479_v11 = vrot.slane %v219_v2, 5 }
  0x2a   : > { %v2186_v12 = vcombine.low %v473_v5, %v476_v6  ;;  %v508_v14 = vsel %vm2757_vm2, %v2083_v62, %v507_v63  ;;  %v509_v15 = vrot.slane %v507_v63, 4  ;;  %v2079_v16 = vrot.slane %v436_v10, 9  ;;  %v218_v18 = vld [vmem:[%s2709_s14 + $0xc] sm:$0xf]  ;;  %v216_v33 = vld [vmem:[%s2709_s14] sm:$0xf] }
  0x2b   : > { %1246 = vrot.lane.b32.xlu1 %v2190_v4, %s2598_s24  ;;  %v481_v20 = vrot.slane %v479_v11, 4  ;;  %v482_v21 = vrot.slane %v233_v8, 5  ;;  %v268_v22 = vshrl.u32 %v218_v18, 16  ;;  %v271_v23 = vshll.u32 %v218_v18, 16  ;;  %v226_v56 = vld [vmem:[%s2709_s14 + $0x3c] sm:$0xf] }
  0x2c   : > { %1238 = vrot.lane.b32.xlu0 %v2186_v12, %s2598_s24  ;;  %v511_v24 = vsel %vm2757_vm2, %v509_v15, %v510_v0  ;;  %v480_v26 = vsel %vm2757_vm2, %v2079_v16, %v479_v11  ;;  %v277_v28 = vshll.u32 %v219_v2, 16  ;;  %v281_v31 = vshrl.u32 %v219_v2, 16 }
  0x2d   : > { %v2191_v34 = vcombine.low %v508_v14, %v511_v24  ;;  %v483_v36 = vsel %vm2757_vm2, %v481_v20, %v482_v21  ;;  %v270_v38 = vrot.slane %v268_v22, 4  ;;  %v273_v42 = vrot.slane %v271_v23, 5  ;;  %v224_v20 = vld [vmem:[%s2709_s14 + $0x30] sm:$0xf] }
  0x2e   : > { %v2187_v43 = vcombine.low %v480_v26, %v483_v36  ;;  %v279_v47 = vrot.slane %v277_v28, 5  ;;  %v283_v49 = vrot.slane %v281_v31, 4  ;;  %v287_v50 = vshll.u32 %v233_v8, 16 }
  0x2f   : > { %1248 = vrot.lane.b32.xlu1 %v2191_v34, %s2598_s24  ;;  %v274_v51 = vor.u32 %v273_v42, %v270_v38  ;;  %v244_v52 = vshrl.u32 %v216_v33, 16  ;;  %v247_v53 = vshll.u32 %v216_v33, 16  ;;  %v253_v55 = vshll.u32 %v2767_v44, 16 }
  0x30   : > { %1240 = vrot.lane.b32.xlu0 %v2187_v43, %s2598_s24  ;;  %v284_v61 = vor.u32 %v283_v49, %v279_v47  ;;  %v289_v62 = vrot.slane %v287_v50, 5  ;;  %v257_v63 = vshrl.u32 %v2767_v44, 16  ;;  %v263_v0 = vshll.u32 %v2776_v48, 16 }
  0x31   : > { %v275_v2 = vrot.slane %v274_v51, 4  ;;  %v246_v4 = vrot.slane %v244_v52, 4  ;;  %v249_v5 = vrot.slane %v247_v53, 5  ;;  %v255_v6 = vrot.slane %v253_v55, 5  ;;  %v2844_v52 = vld [vmem:[%s2709_s14 + $0x44] sm:$0x1] }
  0x32   : > { %v285_v8 = vrot.slane %v284_v61, 4  ;;  %v259_v10 = vrot.slane %v257_v63, 4  ;;  %v265_v11 = vrot.slane %v263_v0, 5  ;;  %v364_v12 = vshrl.u32 %v226_v56, 16 }
  0x33   : > { %v280_v14 = vsel %vm2823_vm5, %v275_v2, %v279_v47  ;;  %v250_v15 = vor.u32 %v249_v5, %v246_v4  ;;  %v367_v16 = vshll.u32 %v226_v56, 16  ;;  %v373_v18 = vshll.u32 %v2784_v54, 16 }
  0x34   : > { %v290_v44 = vsel %vm2823_vm5, %v285_v8, %v289_v62  ;;  %v260_v48 = vor.u32 %v259_v10, %v255_v6  ;;  %v366_v21 = vrot.slane %v364_v12, 4  ;;  %v377_v22 = vshrl.u32 %v2784_v54, 16 }
  0x35   : > { %v2179_v23 = vcombine.low %v280_v14, %v290_v44  ;;  %v251_v24 = vrot.slane %v250_v15, 4  ;;  %v369_v26 = vrot.slane %v367_v16, 5  ;;  %v375_v28 = vrot.slane %v373_v18, 5  ;;  %v2871_v44 = vld [vmem:[%s2709_s14 + $0x50] sm:$0x1] }
  0x36   : > { %v261_v31 = vrot.slane %v260_v48, 4  ;;  %v379_v33 = vrot.slane %v377_v22, 4  ;;  %v383_v34 = vshll.u32 %v2787_v57, 16  ;;  %v340_v36 = vshrl.u32 %v224_v20, 16 }
  0x37   : > { %1200 = vrot.lane.b32.xlu1 %v2179_v23, %s2599_s27  ;;  %v256_v38 = vsel %vm2823_vm5, %v251_v24, %v255_v6  ;;  %v370_v42 = vor.u32 %v369_v26, %v366_v21  ;;  %v343_v43 = vshll.u32 %v224_v20, 16  ;;  %v349_v54 = vshll.u32 %v2746_v32, 16  ;;  %v2855_v6 = vld [vmem:[%s2709_s14 + $0x14] sm:$0x1] }
  0x38   : > { %v266_v47 = vsel %vm2823_vm5, %v261_v31, %v265_v11  ;;  %v380_v49 = vor.u32 %v379_v33, %v375_v28  ;;  %v385_v50 = vrot.slane %v383_v34, 5  ;;  %v342_v51 = vrot.slane %v340_v36, 4  ;;  %v2886_v31 = vld [vmem:[%s2709_s14 + $0x20] sm:$0x1]  ;;  %v2116_v34 = vld [vmem:[%s2709_s14 + $0x3c] sm:$0xe] }
  0x39   : > { %v2178_v57 = vcombine.low %v256_v38, %v266_v47  ;;  %v371_v53 = vrot.slane %v370_v42, 4  ;;  %v345_v55 = vrot.slane %v343_v43, 5  ;;  %v351_v56 = vrot.slane %v349_v54, 5  ;;  %v2112_v54 = vld [vmem:[%s2709_s14 + $0xc] sm:$0xe] }
  0x3a   : > { %v381_v61 = vrot.slane %v380_v49, 4  ;;  %v353_v62 = vshrl.u32 %v2746_v32, 16  ;;  %v359_v63 = vshll.u32 %v2752_v37, 16  ;;  %v662_v0 = vrot.slane %v660_v3, 5 }
  0x3b   : > { %1198 = vrot.lane.b32.xlu0 %v2178_v57, %s2599_s27  ;;  %v376_v2 = vsel %vm2823_vm5, %v371_v53, %v375_v28  ;;  %v346_v4 = vor.u32 %v345_v55, %v342_v51  ;;  %v670_v5 = vshll.u32 %v2844_v52, 16  ;;  %v566_v8 = vrot.slane %v564_v9, 5  ;;  %v2117_v53 = vld [vmem:[%s2709_s14 + $0x48] sm:$0xe] }
  0x3c   : > { %v386_v32 = vsel %vm2823_vm5, %v381_v61, %v385_v50  ;;  %v355_v37 = vrot.slane %v353_v62, 4  ;;  %v361_v10 = vrot.slane %v359_v63, 5  ;;  %v663_v3 = vsel %vm2823_vm5, %v2761_v40, %v662_v0 }
  0x3d   : > { %v2183_v11 = vcombine.low %v376_v2, %v386_v32  ;;  %v347_v12 = vrot.slane %v346_v4, 4  ;;  %v667_v14 = vor.u32 %v2726_v13, %v662_v0  ;;  %v672_v15 = vrot.slane %v670_v5, 5 }
  0x3e   : > { %v356_v16 = vor.u32 %v355_v37, %v351_v56  ;;  %v567_v18 = vsel %vm2823_vm5, %v2769_v45, %v566_v8  ;;  %v571_v9 = vor.u32 %v2732_v19, %v566_v8  ;;  %v574_v20 = vshll.u32 %v2855_v6, 16 }
  0x3f   : > { %1208 = vrot.lane.b32.xlu1 %v2183_v11, %s2599_s27  ;;  %v352_v40 = vsel %vm2823_vm5, %v347_v12, %v351_v56  ;;  %v668_v48 = vrot.slane %v667_v14, 4  ;;  %v682_v13 = vrot.slane %v681_v59, 4  ;;  %v684_v45 = vshll.u32 %v2730_v17, 16 }
  0x40   : > { %v357_v21 = vrot.slane %v356_v16, 4  ;;  %v572_v22 = vrot.slane %v571_v9, 4  ;;  %v576_v19 = vrot.slane %v574_v20, 5  ;;  %v690_v23 = vrot.slane %v688_v25, 4  ;;  %v2938_v20 = vld [vmem:[%s2709_s14 + $0x18] sm:$0xf] }
  0x41   : > { %v673_v24 = vsel %vm2823_vm5, %v668_v48, %v672_v15  ;;  %v686_v26 = vrot.slane %v684_v45, 5  ;;  %v694_v28 = vshll.u32 %v2871_v44, 16  ;;  %v586_v29 = vrot.slane %v585_v60, 4  ;;  %v2931_v15 = vld [vmem:[%s2709_s14 + $0x4c] sm:$0xf] }
  0x42   : > { %v362_v30 = vsel %vm2823_vm5, %v357_v21, %v361_v10  ;;  %v2206_v59 = vcombine.low %v663_v3, %v673_v24  ;;  %v577_v33 = vsel %vm2823_vm5, %v572_v22, %v576_v19  ;;  %v588_v25 = vshll.u32 %v2739_v27, 16  ;;  %v2944_v45 = vld [vmem:[%s2709_s14 + $0x1c] sm:$0xf] }
  0x43   : > { %v2182_v36 = vcombine.low %v352_v40, %v362_v30  ;;  %v2202_v38 = vcombine.low %v567_v18, %v577_v33  ;;  %v687_v42 = vsel %vm2823_vm5, %v682_v13, %v686_v26  ;;  %v691_v43 = vor.u32 %v690_v23, %v686_v26  ;;  %v2954_v23 = vld [vmem:[%s2709_s14 + $0x54] sm:$0xf] }
  0x44   : > { %1334 = vrot.lane.b32.xlu1 %v2206_v59, %s2600_s30  ;;  %v696_v41 = vrot.slane %v694_v28, 5  ;;  %v590_v46 = vrot.slane %v588_v25, 5  ;;  %v594_v60 = vrot.slane %v592_v35, 4  ;;  %v598_v47 = vshll.u32 %v2886_v31, 16 }
  0x45   : > { %1206 = vrot.lane.b32.xlu0 %v2182_v36, %s2599_s27  ;;  %v692_v49 = vrot.slane %v691_v43, 4  ;;  %v2124_v50 = vrot.slane %v2116_v34, 9  ;;  %v808_v51 = vrot.slane %v2713_v1, 5  ;;  %v811_v57 = vrot.slane %v2844_v52, 5  ;;  %v2113_v1 = vld [vmem:[%s2709_s14 + $0x18] sm:$0xe] }
  0x46   : > { %v591_v55 = vsel %vm2823_vm5, %v586_v29, %v590_v46  ;;  %v595_v56 = vor.u32 %v594_v60, %v590_v46  ;;  %v600_v61 = vrot.slane %v598_v47, 5  ;;  %v2120_v62 = vrot.slane %v2112_v54, 9  ;;  %v2960_v29 = vld [vmem:[%s2709_s14 + $0x58] sm:$0xf]  ;;  %v2966_v34 = vld [vmem:[%s2709_s14 + $0x24] sm:$0xf] }
  0x47   : > { %v697_v35 = vsel %vm2823_vm5, %v692_v49, %v696_v41  ;;  %v809_v63 = vsel %vm2757_vm2, %v2124_v50, %v808_v51  ;;  %v810_v0 = vrot.slane %v808_v51, 4  ;;  %v780_v2 = vrot.slane %v2720_v7, 5  ;;  %v2924_v7 = vld [vmem:[%s2709_s14 + $0x48] sm:$0xf]  ;;  %v2980_v49 = vld [vmem:[%s2709_s14 + $0x50] sm:$0x1] }
  0x48   : > { %v2207_v52 = vcombine.low %v687_v42, %v697_v35  ;;  %v596_v4 = vrot.slane %v595_v56, 4  ;;  %v783_v5 = vrot.slane %v2855_v6, 5  ;;  %v2125_v8 = vrot.slane %v2117_v53, 9  ;;  %v2975_v54 = vld [vmem:[%s2709_s14 + $0x28] sm:$0xf] }
  0x49   : > { %1326 = vrot.lane.b32.xlu0 %v2202_v38, %s2600_s30  ;;  %v812_v32 = vsel %vm2757_vm2, %v810_v0, %v811_v57  ;;  %v781_v37 = vsel %vm2757_vm2, %v2120_v62, %v780_v2  ;;  %v782_v10 = vrot.slane %v780_v2, 4  ;;  %v815_v3 = vrot.slane %v2730_v17, 5  ;;  %v2991_v35 = vld [vmem:[%s2709_s14 + $0x20] sm:$0x1] }
  0x4a   : > { %1336 = vrot.lane.b32.xlu1 %v2207_v52, %s2600_s30  ;;  %v601_v6 = vsel %vm2823_vm5, %v596_v4, %v600_v61  ;;  %v2214_v11 = vcombine.low %v809_v63, %v812_v32  ;;  %v818_v12 = vrot.slane %v2871_v44, 5  ;;  %v2121_v14 = vrot.slane %v2113_v1, 9 }
  0x4b   : > { %v2203_v16 = vcombine.low %v591_v55, %v601_v6  ;;  %v784_v18 = vsel %vm2757_vm2, %v782_v10, %v783_v5  ;;  %v816_v17 = vsel %vm2757_vm2, %v2125_v8, %v815_v3  ;;  %v817_v9 = vrot.slane %v815_v3, 4 }
  0x4c   : > { %v2210_v40 = vcombine.low %v781_v37, %v784_v18  ;;  %v787_v48 = vrot.slane %v2739_v27, 5  ;;  %v790_v44 = vrot.slane %v2886_v31, 5  ;;  %v959_v13 = vshrl.u32 %v2924_v7, 16 }
  0x4d   : > { %1328 = vrot.lane.b32.xlu0 %v2203_v16, %s2600_s30  ;;  %v819_v21 = vsel %vm2757_vm2, %v817_v9, %v818_v12  ;;  %v962_v22 = vshll.u32 %v2924_v7, 16  ;;  %v972_v19 = vshrl.u32 %v2931_v15, 16  ;;  %v2222_v27 = vcombine.low %v2924_v7, %v2931_v15 }
  0x4e   : > { %1374 = vrot.lane.b32.xlu1 %v2214_v11, %s2601_s5  ;;  %v2215_v24 = vcombine.low %v816_v17, %v819_v21  ;;  %v788_v26 = vsel %vm2757_vm2, %v2121_v14, %v787_v48  ;;  %v789_v28 = vrot.slane %v787_v48, 4  ;;  %v961_v31 = vrot.slane %v959_v13, 4  ;;  %v3000_v11 = vld [vmem:[%s2709_s14 + $0x5c] sm:$0x1] }
  0x4f   : > { %v964_v30 = vrot.slane %v962_v22, 5  ;;  %v863_v59 = vshrl.u32 %v2938_v20, 16  ;;  %v866_v33 = vshll.u32 %v2938_v20, 16  ;;  %v876_v25 = vshrl.u32 %v2944_v45, 16  ;;  %v3011_v22 = vld [vmem:[%s2709_s14 + $0x2c] sm:$0x1] }
  0x50   : > { %v791_v36 = vsel %vm2757_vm2, %v789_v28, %v790_v44  ;;  %v2218_v38 = vcombine.low %v2938_v20, %v2944_v45  ;;  %v983_v42 = vshrl.u32 %v2954_v23, 16  ;;  %v986_v43 = vshll.u32 %v2954_v23, 16 }
  0x51   : > { %1366 = vrot.lane.b32.xlu0 %v2210_v40, %s2601_s5  ;;  %v2211_v41 = vcombine.low %v788_v26, %v791_v36  ;;  %v865_v46 = vrot.slane %v863_v59, 4  ;;  %v868_v60 = vrot.slane %v866_v33, 5  ;;  %v996_v47 = vshrl.u32 %v2960_v29, 16 }
  0x52   : > { %1376 = vrot.lane.b32.xlu1 %v2215_v24, %s2601_s5  ;;  %v985_v50 = vrot.slane %v983_v42, 4  ;;  %v988_v51 = vrot.slane %v986_v43, 5  ;;  %v2223_v57 = vcombine.low %v2954_v23, %v2960_v29  ;;  %v887_v53 = vshrl.u32 %v2966_v34, 16  ;;  %v2154_v43 = vld [vmem:[%s2709_s14 + $0x18] sm:$0xe] }
  0x53   : > { %v890_v55 = vshll.u32 %v2966_v34, 16  ;;  %v900_v56 = vshrl.u32 %v2975_v54, 16  ;;  %v2219_v61 = vcombine.low %v2966_v34, %v2975_v54  ;;  %v965_v62 = vor.u32 %v964_v30, %v961_v31  ;;  %v2158_v31 = vld [vmem:[%s2709_s14 + $0x48] sm:$0xe] }
  0x54   : > { %v889_v63 = vrot.slane %v887_v53, 4  ;;  %v968_v0 = vshll.u32 %v2931_v15, 16  ;;  %v974_v2 = vrot.slane %v972_v19, 4  ;;  %v978_v1 = vshll.u32 %v2980_v49, 16 }
  0x55   : > { %1368 = vrot.lane.b32.xlu0 %v2211_v41, %s2601_s5  ;;  %v892_v52 = vrot.slane %v890_v55, 5  ;;  %v966_v4 = vrot.slane %v965_v62, 4  ;;  %v869_v5 = vor.u32 %v868_v60, %v865_v46  ;;  %v872_v8 = vshll.u32 %v2944_v45, 16 }
  0x56   : > { %1422 = vrot.lane.b32.xlu1 %v2222_v27, %s2602_s6  ;;  %v970_v32 = vrot.slane %v968_v0, 5  ;;  %v980_v37 = vrot.slane %v978_v1, 5  ;;  %v878_v10 = vrot.slane %v876_v25, 4  ;;  %v882_v3 = vshll.u32 %v2991_v35, 16  ;;  %v3034_v0 = vld [vmem:[%s2709_s14 + $0x4c] sm:$0xf] }
  0x57   : > { %v870_v7 = vrot.slane %v869_v5, 4  ;;  %v874_v6 = vrot.slane %v872_v8, 5  ;;  %v989_v12 = vor.u32 %v988_v51, %v985_v50  ;;  %v992_v14 = vshll.u32 %v2960_v29, 16  ;;  %v228_v50 = vld [vmem:[%s2709_s14 + $0x48] sm:$0xf] }
  0x58   : > { %v971_v16 = vsel %vm2823_vm5, %v966_v4, %v970_v32  ;;  %v975_v18 = vor.u32 %v974_v2, %v970_v32  ;;  %v884_v17 = vrot.slane %v882_v3, 5  ;;  %v998_v9 = vrot.slane %v996_v47, 4  ;;  %v3045_v5 = vld [vmem:[%s2709_s14 + $0x50] sm:$0x1]  ;;  %v220_v32 = vld [vmem:[%s2709_s14 + $0x18] sm:$0xf] }
  0x59   : > { %1414 = vrot.lane.b32.xlu0 %v2218_v38, %s2602_s6  ;;  %v875_v20 = vsel %vm2823_vm5, %v870_v7, %v874_v6  ;;  %v879_v40 = vor.u32 %v878_v10, %v874_v6  ;;  %v990_v48 = vrot.slane %v989_v12, 4  ;;  %v994_v44 = vrot.slane %v992_v14, 5  ;;  %v3053_v7 = vld [vmem:[%s2709_s14 + $0x1c] sm:$0xf] }
  0x5a   : > { %1424 = vrot.lane.b32.xlu1 %v2223_v57, %s2602_s6  ;;  %v976_v13 = vrot.slane %v975_v18, 4  ;;  %v1002_v21 = vshll.u32 %v3000_v11, 16  ;;  %v893_v19 = vor.u32 %v892_v52, %v889_v63  ;;  %v896_v27 = vshll.u32 %v2975_v54, 16  ;;  %v3059_v18 = vld [vmem:[%s2709_s14 + $0x20] sm:$0x1] }
  0x5b   : > { %v880_v23 = vrot.slane %v879_v40, 4  ;;  %v995_v24 = vsel %vm2823_vm5, %v990_v48, %v994_v44  ;;  %v999_v26 = vor.u32 %v998_v9, %v994_v44  ;;  %v902_v28 = vrot.slane %v900_v56, 4 }
  0x5c   : > { %v981_v30 = vsel %vm2823_vm5, %v976_v13, %v980_v37  ;;  %v1004_v59 = vrot.slane %v1002_v21, 5  ;;  %v894_v33 = vrot.slane %v893_v19, 4  ;;  %v898_v25 = vrot.slane %v896_v27, 5  ;;  %v2159_v19 = vld [vmem:[%s2709_s14 + $0x54] sm:$0xe] }
  0x5d   : > { %1416 = vrot.lane.b32.xlu0 %v2219_v61, %s2602_s6  ;;  %v2230_v34 = vcombine.low %v971_v16, %v981_v30  ;;  %v885_v36 = vsel %vm2823_vm5, %v880_v23, %v884_v17  ;;  %v1000_v38 = vrot.slane %v999_v26, 4  ;;  %v906_v42 = vshll.u32 %v3011_v22, 16 }
  0x5e   : > { %v2226_v41 = vcombine.low %v875_v20, %v885_v36  ;;  %v899_v46 = vsel %vm2823_vm5, %v894_v33, %v898_v25  ;;  %v903_v60 = vor.u32 %v902_v28, %v898_v25  ;;  %v2166_v47 = vrot.slane %v2158_v31, 9  ;;  %v2155_v33 = vld [vmem:[%s2709_s14 + $0x24] sm:$0xe] }
  0x5f   : > { %1462 = vrot.lane.b32.xlu1 %v2230_v34, %s2603_s8  ;;  %v1005_v51 = vsel %vm2823_vm5, %v1000_v38, %v1004_v59  ;;  %v908_v57 = vrot.slane %v906_v42, 5  ;;  %v1116_v53 = vrot.slane %v2931_v15, 5  ;;  %v1119_v55 = vrot.slane %v2980_v49, 5 }
  0x60   : > { %v2231_v56 = vcombine.low %v995_v24, %v1005_v51  ;;  %v904_v61 = vrot.slane %v903_v60, 4  ;;  %v2162_v62 = vrot.slane %v2154_v43, 9  ;;  %v1088_v63 = vrot.slane %v2944_v45, 5  ;;  %v3075_v60 = vld [vmem:[%s2709_s14 + $0x54] sm:$0xf] }
  0x61   : > { %1454 = vrot.lane.b32.xlu0 %v2226_v41, %s2603_s8  ;;  %v1117_v2 = vsel %vm2757_vm2, %v2166_v47, %v1116_v53  ;;  %v1118_v1 = vrot.slane %v1116_v53, 4  ;;  %v1091_v52 = vrot.slane %v2991_v35, 5  ;;  %v388_v15 = vshrl.u32 %v228_v50, 16 }
  0x62   : > { %v909_v49 = vsel %vm2823_vm5, %v904_v61, %v908_v57  ;;  %v1089_v4 = vsel %vm2757_vm2, %v2162_v62, %v1088_v63  ;;  %v1090_v45 = vrot.slane %v1088_v63, 4  ;;  %v391_v8 = vshll.u32 %v228_v50, 16  ;;  %v3084_v61 = vld [vmem:[%s2709_s14 + $0x58] sm:$0xf] }
  0x63   : > { %1464 = vrot.lane.b32.xlu1 %v2231_v56, %s2603_s8  ;;  %v2227_v37 = vcombine.low %v899_v46, %v909_v49  ;;  %v1120_v10 = vsel %vm2757_vm2, %v1118_v1, %v1119_v55  ;;  %v390_v35 = vrot.slane %v388_v15, 4  ;;  %v397_v3 = vshll.u32 %v3034_v0, 16  ;;  %v3097_v49 = vld [vmem:[%s2709_s14 + $0x24] sm:$0xf] }
  0x64   : > { %v2238_v6 = vcombine.low %v1117_v2, %v1120_v10  ;;  %v1092_v12 = vsel %vm2757_vm2, %v1090_v45, %v1091_v52  ;;  %v393_v14 = vrot.slane %v391_v8, 5  ;;  %v401_v16 = vshrl.u32 %v3034_v0, 16  ;;  %v3089_v2 = vld [vmem:[%s2709_s14 + $0x5c] sm:$0x1] }
  0x65   : > { %1456 = vrot.lane.b32.xlu0 %v2227_v37, %s2603_s8  ;;  %v2234_v17 = vcombine.low %v1089_v4, %v1092_v12  ;;  %v399_v9 = vrot.slane %v397_v3, 5  ;;  %v407_v20 = vshll.u32 %v3045_v5, 16  ;;  %v292_v40 = vshrl.u32 %v220_v32, 16  ;;  %v3105_v37 = vld [vmem:[%s2709_s14 + $0x28] sm:$0xf] }
  0x66   : > { %v394_v48 = vor.u32 %v393_v14, %v390_v35  ;;  %v403_v44 = vrot.slane %v401_v16, 4  ;;  %v295_v13 = vshll.u32 %v220_v32, 16  ;;  %v301_v21 = vshll.u32 %v3053_v7, 16  ;;  %v3112_v12 = vld [vmem:[%s2709_s14 + $0x2c] sm:$0x1] }
  0x67   : > { %1502 = vrot.lane.b32.xlu1 %v2238_v6, %s2604_s9  ;;  %v409_v27 = vrot.slane %v407_v20, 5  ;;  %v294_v23 = vrot.slane %v292_v40, 4  ;;  %v305_v24 = vshrl.u32 %v3053_v7, 16  ;;  %v311_v26 = vshll.u32 %v3059_v18, 16  ;;  %v441_v20 = vld [vmem:[%s2709_s14 + $0x48] sm:$0xe] }
  0x68   : > { %v395_v28 = vrot.slane %v394_v48, 4  ;;  %v404_v31 = vor.u32 %v403_v44, %v399_v9  ;;  %v297_v30 = vrot.slane %v295_v13, 5  ;;  %v303_v59 = vrot.slane %v301_v21, 5 }
  0x69   : > { %1494 = vrot.lane.b32.xlu0 %v2234_v17, %s2604_s9  ;;  %v307_v25 = vrot.slane %v305_v24, 4  ;;  %v313_v34 = vrot.slane %v311_v26, 5  ;;  %v2167_v36 = vrot.slane %v2159_v19, 9  ;;  %v1123_v38 = vrot.slane %v2960_v29, 5  ;;  %v437_v24 = vld [vmem:[%s2709_s14 + $0x18] sm:$0xe] }
  0x6a   : > { %v400_v42 = vsel %vm2823_vm5, %v395_v28, %v399_v9  ;;  %v405_v43 = vrot.slane %v404_v31, 4  ;;  %v298_v41 = vor.u32 %v297_v30, %v294_v23  ;;  %v1126_v46 = vrot.slane %v3000_v11, 5 }
  0x6b   : > { %v308_v47 = vor.u32 %v307_v25, %v303_v59  ;;  %v1124_v50 = vsel %vm2757_vm2, %v2167_v36, %v1123_v38  ;;  %v1125_v51 = vrot.slane %v1123_v38, 4  ;;  %v2163_v57 = vrot.slane %v2155_v33, 9 }
  0x6c   : > { %v410_v29 = vsel %vm2823_vm5, %v405_v43, %v409_v27  ;;  %v299_v53 = vrot.slane %v298_v41, 4  ;;  %v1095_v55 = vrot.slane %v2975_v54, 5  ;;  %v1098_v56 = vrot.slane %v3011_v22, 5  ;;  %v442_v41 = vld [vmem:[%s2709_s14 + $0x54] sm:$0xe] }
  0x6d   : > { %v2184_v11 = vcombine.low %v400_v42, %v410_v29  ;;  %v309_v62 = vrot.slane %v308_v47, 4  ;;  %v1127_v63 = vsel %vm2757_vm2, %v1125_v51, %v1126_v46  ;;  %v412_v1 = vshrl.u32 %v3075_v60, 16 }
  0x6e   : > { %v304_v52 = vsel %vm2823_vm5, %v299_v53, %v303_v59  ;;  %v2239_v15 = vcombine.low %v1124_v50, %v1127_v63  ;;  %v1096_v54 = vsel %vm2757_vm2, %v2163_v57, %v1095_v55  ;;  %v1097_v22 = vrot.slane %v1095_v55, 4 }
  0x6f   : > { %1210 = vrot.lane.b32.xlu1 %v2184_v11, %s2599_s27  ;;  %v314_v4 = vsel %vm2823_vm5, %v309_v62, %v313_v34  ;;  %v414_v45 = vrot.slane %v412_v1, 4  ;;  %v415_v8 = vshll.u32 %v3075_v60, 16  ;;  %v421_v32 = vshll.u32 %v3084_v61, 16 }
  0x70   : > { %v2180_v10 = vcombine.low %v304_v52, %v314_v4  ;;  %v1099_v35 = vsel %vm2757_vm2, %v1097_v22, %v1098_v56  ;;  %v425_v3 = vshrl.u32 %v3084_v61, 16  ;;  %v431_v6 = vshll.u32 %v3089_v2, 16 }
  0x71   : > { %v2235_v14 = vcombine.low %v1096_v54, %v1099_v35  ;;  %v417_v16 = vrot.slane %v415_v8, 5  ;;  %v423_v17 = vrot.slane %v421_v32, 5  ;;  %v316_v9 = vshrl.u32 %v3097_v49, 16 }
  0x72   : > { %1202 = vrot.lane.b32.xlu0 %v2180_v10, %s2599_s27  ;;  %v427_v40 = vrot.slane %v425_v3, 4  ;;  %v433_v48 = vrot.slane %v431_v6, 5  ;;  %v319_v44 = vshll.u32 %v3097_v49, 16  ;;  %v325_v13 = vshll.u32 %v3105_v37, 16  ;;  %v3158_v3 = vld [vmem:[%s2709_s14 + $0x24] sm:$0xf] }
  0x73   : > { %1504 = vrot.lane.b32.xlu1 %v2239_v15, %s2604_s9  ;;  %v418_v21 = vor.u32 %v417_v16, %v414_v45  ;;  %v318_v19 = vrot.slane %v316_v9, 4  ;;  %v329_v27 = vshrl.u32 %v3105_v37, 16  ;;  %v335_v23 = vshll.u32 %v3112_v12, 16  ;;  %v3151_v45 = vld [vmem:[%s2709_s14 + $0x58] sm:$0xf] }
  0x74   : > { %v428_v26 = vor.u32 %v427_v40, %v423_v17  ;;  %v321_v28 = vrot.slane %v319_v44, 5  ;;  %v327_v31 = vrot.slane %v325_v13, 5  ;;  %v2084_v30 = vrot.slane %v441_v20, 9  ;;  %v3169_v40 = vld [vmem:[%s2709_s14 + $0x28] sm:$0xf] }
  0x75   : > { %v419_v59 = vrot.slane %v418_v21, 4  ;;  %v331_v33 = vrot.slane %v329_v27, 4  ;;  %v337_v25 = vrot.slane %v335_v23, 5  ;;  %v514_v34 = vrot.slane %v3034_v0, 5  ;;  %v3179_v27 = vld [vmem:[%s2709_s14 + $0x64] sm:$0xf] }
  0x76   : > { %1496 = vrot.lane.b32.xlu0 %v2235_v14, %s2604_s9  ;;  %v429_v36 = vrot.slane %v428_v26, 4  ;;  %v322_v38 = vor.u32 %v321_v28, %v318_v19  ;;  %v517_v42 = vrot.slane %v3045_v5, 5  ;;  %v2080_v43 = vrot.slane %v437_v24, 9  ;;  %v438_v5 = vld [vmem:[%s2709_s14 + $0x24] sm:$0xe] }
  0x77   : > { %v424_v46 = vsel %vm2823_vm5, %v419_v59, %v423_v17  ;;  %v332_v47 = vor.u32 %v331_v33, %v327_v31  ;;  %v515_v50 = vsel %vm2757_vm2, %v2084_v30, %v514_v34  ;;  %v516_v51 = vrot.slane %v514_v34, 4  ;;  %v2102_v19 = vld [vmem:[%s2709_s14 + $0x60] sm:$0xf]  ;;  %v3188_v30 = vld [vmem:[%s2709_s14 + $0x34] sm:$0xf] }
  0x78   : > { %v434_v0 = vsel %vm2823_vm5, %v429_v36, %v433_v48  ;;  %v323_v57 = vrot.slane %v322_v38, 4  ;;  %v486_v29 = vrot.slane %v3053_v7, 5  ;;  %v489_v53 = vrot.slane %v3059_v18, 5  ;;  %v3143_v7 = vld [vmem:[%s2709_s14 + $0x54] sm:$0xf] }
  0x79   : > { %v2185_v55 = vcombine.low %v424_v46, %v434_v0  ;;  %v333_v56 = vrot.slane %v332_v47, 4  ;;  %v518_v11 = vsel %vm2757_vm2, %v516_v51, %v517_v42  ;;  %v2085_v62 = vrot.slane %v442_v41, 9  ;;  %v3201_v51 = vld [vmem:[%s2709_s14 + $0x5c] sm:$0x1] }
  0x7a   : > { %v328_v63 = vsel %vm2823_vm5, %v323_v57, %v327_v31  ;;  %v2192_v1 = vcombine.low %v515_v50, %v518_v11  ;;  %v487_v52 = vsel %vm2757_vm2, %v2080_v43, %v486_v29  ;;  %v488_v15 = vrot.slane %v486_v29, 4  ;;  %v3185_v31 = vld [vmem:[%s2709_s14 + $0x30] sm:$0xf] }
  0x7b   : > { %1212 = vrot.lane.b32.xlu1 %v2185_v55, %s2599_s27  ;;  %v338_v18 = vsel %vm2823_vm5, %v333_v56, %v337_v25  ;;  %v521_v54 = vrot.slane %v3084_v61, 5  ;;  %v524_v22 = vrot.slane %v3089_v2, 5  ;;  %v2081_v4 = vrot.slane %v438_v5, 9  ;;  %v3206_v5 = vld [vmem:[%s2709_s14 + $0x2c] sm:$0x1] }
  0x7c   : > { %v2181_v8 = vcombine.low %v328_v63, %v338_v18  ;;  %v490_v32 = vsel %vm2757_vm2, %v488_v15, %v489_v53  ;;  %v493_v10 = vrot.slane %v3105_v37, 5  ;;  %v496_v35 = vrot.slane %v3112_v12, 5 }
  0x7d   : > { %v2188_v6 = vcombine.low %v487_v52, %v490_v32  ;;  %v522_v2 = vsel %vm2757_vm2, %v2085_v62, %v521_v54  ;;  %v523_v14 = vrot.slane %v521_v54, 4  ;;  %v699_v16 = vshrl.u32 %v3143_v7, 16 }
  0x7e   : > { %1204 = vrot.lane.b32.xlu0 %v2181_v8, %s2599_s27  ;;  %v494_v17 = vsel %vm2757_vm2, %v2081_v4, %v493_v10  ;;  %v495_v9 = vrot.slane %v493_v10, 4  ;;  %v702_v12 = vshll.u32 %v3143_v7, 16  ;;  %v712_v20 = vshrl.u32 %v3151_v45, 16  ;;  %v3215_v10 = vld [vmem:[%s2709_s14 + $0x68] sm:$0x1] }
  0x7f   : > { %1250 = vrot.lane.b32.xlu1 %v2192_v1, %s2598_s24  ;;  %v525_v48 = vsel %vm2757_vm2, %v523_v14, %v524_v22  ;;  %v701_v44 = vrot.slane %v699_v16, 4  ;;  %v2200_v13 = vcombine.low %v3143_v7, %v3151_v45  ;;  %v603_v21 = vshrl.u32 %v3158_v3, 16 }
  0x80   : > { %v2193_v23 = vcombine.low %v522_v2, %v525_v48  ;;  %v497_v24 = vsel %vm2757_vm2, %v495_v9, %v496_v35  ;;  %v704_v26 = vrot.slane %v702_v12, 5  ;;  %v606_v28 = vshll.u32 %v3158_v3, 16 }
  0x81   : > { %v2189_v59 = vcombine.low %v494_v17, %v497_v24  ;;  %v605_v33 = vrot.slane %v603_v21, 4  ;;  %v616_v25 = vshrl.u32 %v3169_v40, 16  ;;  %v2196_v34 = vcombine.low %v3158_v3, %v3169_v40 }
  0x82   : > { %1242 = vrot.lane.b32.xlu0 %v2188_v6, %s2598_s24  ;;  %v608_v36 = vrot.slane %v606_v28, 5  ;;  %v723_v38 = vshrl.u32 %v2102_v19, 16  ;;  %v726_v42 = vshll.u32 %v2102_v19, 16  ;;  %v736_v43 = vshrl.u32 %v3179_v27, 16  ;;  %v2118_v28 = vld [vmem:[%s2709_s14 + $0x54] sm:$0xe] }
  0x83   : > { %1252 = vrot.lane.b32.xlu1 %v2193_v23, %s2598_s24  ;;  %v2201_v41 = vcombine.low %v2102_v19, %v3179_v27  ;;  %v627_v46 = vshrl.u32 %v3185_v31, 16  ;;  %v630_v47 = vshll.u32 %v3185_v31, 16  ;;  %v640_v50 = vshrl.u32 %v3188_v30, 16 }
  0x84   : > { %v725_v0 = vrot.slane %v723_v38, 4  ;;  %v728_v57 = vrot.slane %v726_v42, 5  ;;  %v2197_v29 = vcombine.low %v3185_v31, %v3188_v30  ;;  %v705_v53 = vor.u32 %v704_v26, %v701_v44  ;;  %v3226_v44 = vld [vmem:[%s2709_s14 + $0x38] sm:$0x1] }
  0x85   : > { %v629_v55 = vrot.slane %v627_v46, 4  ;;  %v632_v56 = vrot.slane %v630_v47, 5  ;;  %v708_v11 = vshll.u32 %v3151_v45, 16  ;;  %v714_v62 = vrot.slane %v712_v20, 4 }
  0x86   : > { %1244 = vrot.lane.b32.xlu0 %v2189_v59, %s2598_s24  ;;  %v706_v63 = vrot.slane %v705_v53, 4  ;;  %v718_v1 = vshll.u32 %v3201_v51, 16  ;;  %v609_v52 = vor.u32 %v608_v36, %v605_v33  ;;  %v612_v15 = vshll.u32 %v3169_v40, 16 }
  0x87   : > { %1298 = vrot.lane.b32.xlu1 %v2200_v13, %s2597_s23  ;;  %v710_v7 = vrot.slane %v708_v11, 5  ;;  %v618_v18 = vrot.slane %v616_v25, 4  ;;  %v622_v54 = vshll.u32 %v3206_v5, 16  ;;  %v729_v22 = vor.u32 %v728_v57, %v725_v0  ;;  %v2119_v0 = vld [vmem:[%s2709_s14 + $0x60] sm:$0xe] }
  0x88   : > { %v720_v4 = vrot.slane %v718_v1, 5  ;;  %v610_v8 = vrot.slane %v609_v52, 4  ;;  %v614_v32 = vrot.slane %v612_v15, 5  ;;  %v732_v35 = vshll.u32 %v3179_v27, 16  ;;  %v2115_v1 = vld [vmem:[%s2709_s14 + $0x30] sm:$0xe] }
  0x89   : > { %v711_v3 = vsel %vm2823_vm5, %v706_v63, %v710_v7  ;;  %v715_v6 = vor.u32 %v714_v62, %v710_v7  ;;  %v624_v2 = vrot.slane %v622_v54, 5  ;;  %v730_v14 = vrot.slane %v729_v22, 4  ;;  %v3259_v22 = vld [vmem:[%s2709_s14 + $0x60] sm:$0xf] }
  0x8a   : > { %1290 = vrot.lane.b32.xlu0 %v2196_v34, %s2597_s23  ;;  %v615_v16 = vsel %vm2823_vm5, %v610_v8, %v614_v32  ;;  %v619_v17 = vor.u32 %v618_v18, %v614_v32  ;;  %v734_v9 = vrot.slane %v732_v35, 5  ;;  %v738_v12 = vrot.slane %v736_v43, 4  ;;  %v2114_v43 = vld [vmem:[%s2709_s14 + $0x24] sm:$0xe] }
  0x8b   : > { %1300 = vrot.lane.b32.xlu1 %v2201_v41, %s2597_s23  ;;  %v716_v20 = vrot.slane %v715_v6, 4  ;;  %v742_v48 = vshll.u32 %v3215_v10, 16  ;;  %v633_v13 = vor.u32 %v632_v56, %v629_v55  ;;  %v636_v21 = vshll.u32 %v3188_v30, 16 }
  0x8c   : > { %v620_v19 = vrot.slane %v619_v17, 4  ;;  %v735_v23 = vsel %vm2823_vm5, %v730_v14, %v734_v9  ;;  %v739_v24 = vor.u32 %v738_v12, %v734_v9  ;;  %v642_v26 = vrot.slane %v640_v50, 4 }
  0x8d   : > { %v721_v31 = vsel %vm2823_vm5, %v716_v20, %v720_v4  ;;  %v744_v59 = vrot.slane %v742_v48, 5  ;;  %v634_v33 = vrot.slane %v633_v13, 4  ;;  %v638_v25 = vrot.slane %v636_v21, 5  ;;  %v3282_v20 = vld [vmem:[%s2709_s14 + $0x34] sm:$0xf] }
  0x8e   : > { %1292 = vrot.lane.b32.xlu0 %v2197_v29, %s2597_s23  ;;  %v2208_v34 = vcombine.low %v711_v3, %v721_v31  ;;  %v625_v36 = vsel %vm2823_vm5, %v620_v19, %v624_v2  ;;  %v740_v38 = vrot.slane %v739_v24, 4  ;;  %v646_v42 = vshll.u32 %v3226_v44, 16  ;;  %v3268_v3 = vld [vmem:[%s2709_s14 + $0x64] sm:$0xf] }
  0x8f   : > { %v2204_v41 = vcombine.low %v615_v16, %v625_v36  ;;  %v639_v46 = vsel %vm2823_vm5, %v634_v33, %v638_v25  ;;  %v643_v47 = vor.u32 %v642_v26, %v638_v25  ;;  %v2126_v50 = vrot.slane %v2118_v28, 9  ;;  %v3275_v16 = vld [vmem:[%s2709_s14 + $0x30] sm:$0xf] }
  0x90   : > { %1338 = vrot.lane.b32.xlu1 %v2208_v34, %s2600_s30  ;;  %v745_v57 = vsel %vm2823_vm5, %v740_v38, %v744_v59  ;;  %v648_v29 = vrot.slane %v646_v42, 5  ;;  %v822_v53 = vrot.slane %v3151_v45, 5  ;;  %v825_v55 = vrot.slane %v3201_v51, 5  ;;  %v3297_v28 = vld [vmem:[%s2709_s14 + $0x70] sm:$0xf] }
  0x91   : > { %v2209_v56 = vcombine.low %v735_v23, %v745_v57  ;;  %v644_v11 = vrot.slane %v643_v47, 4  ;;  %v2122_v62 = vrot.slane %v2114_v43, 9  ;;  %v794_v63 = vrot.slane %v3169_v40, 5  ;;  %v3261_v4 = vpop.permute.xlu1 %1294  ;;  %v3291_v23 = vld [vmem:[%s2709_s14 + $0x6c] sm:$0xf] }
  0x92   : > { %1330 = vrot.lane.b32.xlu0 %v2204_v41, %s2600_s30  ;;  %v823_v52 = vsel %vm2757_vm2, %v2126_v50, %v822_v53  ;;  %v824_v15 = vrot.slane %v822_v53, 4  ;;  %v797_v7 = vrot.slane %v3206_v5, 5  ;;  %v2127_v18 = vrot.slane %v2119_v0, 9  ;;  %v3303_v34 = vld [vmem:[%s2709_s14 + $0x3c] sm:$0xf]  ;;  %v3305_v36 = vpop.permute.xlu0 %1286 }
  0x93   : > { %v649_v45 = vsel %vm2823_vm5, %v644_v11, %v648_v29  ;;  %v795_v51 = vsel %vm2757_vm2, %v2122_v62, %v794_v63  ;;  %v796_v54 = vrot.slane %v794_v63, 4  ;;  %v829_v40 = vrot.slane %v3179_v27, 5  ;;  %v3317_v47 = vld [vmem:[%s2709_s14 + $0x40] sm:$0xf]  ;;  %v3321_v53 = vld [vmem:[%s2709_s14 + $0x68] sm:$0x1] }
  0x94   : > { %1340 = vrot.lane.b32.xlu1 %v2209_v56, %s2600_s30  ;;  %v2205_v8 = vcombine.low %v639_v46, %v649_v45  ;;  %v826_v5 = vsel %vm2757_vm2, %v824_v15, %v825_v55  ;;  %v832_v32 = vrot.slane %v3215_v10, 5  ;;  %v2123_v35 = vrot.slane %v2115_v1, 9 }
  0x95   : > { %v2216_v6 = vcombine.low %v823_v52, %v826_v5  ;;  %v798_v27 = vsel %vm2757_vm2, %v796_v54, %v797_v7  ;;  %v830_v2 = vsel %vm2757_vm2, %v2127_v18, %v829_v40  ;;  %v831_v14 = vrot.slane %v829_v40, 4  ;;  %v3307_v38 = vpop.permute.xlu1 %1296  ;;  %v3332_v7 = vld [vmem:[%s2709_s14 + $0x38] sm:$0x1] }
  0x96   : > { %1332 = vrot.lane.b32.xlu0 %v2205_v8, %s2600_s30  ;;  %v2212_v17 = vcombine.low %v795_v51, %v798_v27  ;;  %v801_v10 = vrot.slane %v3188_v30, 5  ;;  %v804_v9 = vrot.slane %v3226_v44, 5  ;;  %v1007_v12 = vshrl.u32 %v3259_v22, 16 }
  0x97   : > { %v833_v48 = vsel %vm2757_vm2, %v831_v14, %v832_v32  ;;  %v1010_v13 = vshll.u32 %v3259_v22, 16  ;;  %v1020_v21 = vshrl.u32 %v3268_v3, 16  ;;  %v2224_v19 = vcombine.low %v3259_v22, %v3268_v3  ;;  %v3338_v32 = vpop.permute.xlu0 %1288 }
  0x98   : > { %1378 = vrot.lane.b32.xlu1 %v2216_v6, %s2601_s5  ;;  %v2217_v30 = vcombine.low %v830_v2, %v833_v48  ;;  %v802_v44 = vsel %vm2757_vm2, %v2123_v35, %v801_v10  ;;  %v803_v24 = vrot.slane %v801_v10, 4  ;;  %v1009_v26 = vrot.slane %v1007_v12, 4  ;;  %v3345_v10 = vld [vmem:[%s2709_s14 + $0x74] sm:$0x1] }
  0x99   : > { %v1012_v31 = vrot.slane %v1010_v13, 5  ;;  %v911_v59 = vshrl.u32 %v3275_v16, 16  ;;  %v914_v33 = vshll.u32 %v3275_v16, 16  ;;  %v924_v25 = vshrl.u32 %v3282_v20, 16 }
  0x9a   : > { %1370 = vrot.lane.b32.xlu0 %v2212_v17, %s2601_s5  ;;  %v805_v42 = vsel %vm2757_vm2, %v803_v24, %v804_v9  ;;  %v2220_v43 = vcombine.low %v3275_v16, %v3282_v20  ;;  %v1031_v41 = vshrl.u32 %v3291_v23, 16  ;;  %v1034_v46 = vshll.u32 %v3291_v23, 16 }
  0x9b   : > { %v2213_v50 = vcombine.low %v802_v44, %v805_v42  ;;  %v913_v0 = vrot.slane %v911_v59, 4  ;;  %v916_v57 = vrot.slane %v914_v33, 5  ;;  %v1044_v29 = vshrl.u32 %v3297_v28, 16  ;;  %v3356_v59 = vld [vmem:[%s2709_s14 + $0x44] sm:$0x1] }
  0x9c   : > { %1380 = vrot.lane.b32.xlu1 %v2217_v30, %s2601_s5  ;;  %v1033_v55 = vrot.slane %v1031_v41, 4  ;;  %v1036_v56 = vrot.slane %v1034_v46, 5  ;;  %v2225_v11 = vcombine.low %v3291_v23, %v3297_v28  ;;  %v935_v62 = vshrl.u32 %v3303_v34, 16  ;;  %v2160_v46 = vld [vmem:[%s2709_s14 + $0x60] sm:$0xe] }
  0x9d   : > { %v938_v63 = vshll.u32 %v3303_v34, 16  ;;  %v948_v1 = vshrl.u32 %v3317_v47, 16  ;;  %v2221_v52 = vcombine.low %v3303_v34, %v3317_v47  ;;  %v1013_v15 = vor.u32 %v1012_v31, %v1009_v26  ;;  %v3340_v35 = vpop.permute.xlu1 %1246 }
  0x9e   : > { %1372 = vrot.lane.b32.xlu0 %v2213_v50, %s2601_s5  ;;  %v937_v18 = vrot.slane %v935_v62, 4  ;;  %v1016_v45 = vshll.u32 %v3268_v3, 16  ;;  %v1022_v51 = vrot.slane %v1020_v21, 4  ;;  %v1026_v54 = vshll.u32 %v3321_v53, 16  ;;  %v3362_v50 = vpop.permute.xlu0 %1238 }
  0x9f   : > { %v940_v40 = vrot.slane %v938_v63, 5  ;;  %v1014_v22 = vrot.slane %v1013_v15, 4  ;;  %v917_v8 = vor.u32 %v916_v57, %v913_v0  ;;  %v920_v5 = vshll.u32 %v3282_v20, 16  ;;  %v2156_v15 = vld [vmem:[%s2709_s14 + $0x30] sm:$0xe] }
  0xa0   : > { %1426 = vrot.lane.b32.xlu1 %v2224_v19, %s2602_s6  ;;  %v1018_v6 = vrot.slane %v1016_v45, 5  ;;  %v1028_v27 = vrot.slane %v1026_v54, 5  ;;  %v926_v2 = vrot.slane %v924_v25, 4  ;;  %v930_v14 = vshll.u32 %v3332_v7, 16  ;;  %v2161_v54 = vld [vmem:[%s2709_s14 + $0x6c] sm:$0xe] }
  0xa1   : > { %v918_v16 = vrot.slane %v917_v8, 4  ;;  %v922_v17 = vrot.slane %v920_v5, 5  ;;  %v1037_v9 = vor.u32 %v1036_v56, %v1033_v55  ;;  %v1040_v12 = vshll.u32 %v3297_v28, 16  ;;  %v3364_v0 = vpop.permute.xlu1 %1248 }
  0xa2   : > { %1418 = vrot.lane.b32.xlu0 %v2220_v43, %s2602_s6  ;;  %v1019_v48 = vsel %vm2823_vm5, %v1014_v22, %v1018_v6  ;;  %v1023_v13 = vor.u32 %v1022_v51, %v1018_v6  ;;  %v932_v21 = vrot.slane %v930_v14, 5  ;;  %v1046_v19 = vrot.slane %v1044_v29, 4 }
  0xa3   : > { %v923_v23 = vsel %vm2823_vm5, %v918_v16, %v922_v17  ;;  %v927_v30 = vor.u32 %v926_v2, %v922_v17  ;;  %v1038_v44 = vrot.slane %v1037_v9, 4  ;;  %v1042_v24 = vrot.slane %v1040_v12, 5  ;;  %v2157_v16 = vld [vmem:[%s2709_s14 + $0x3c] sm:$0xe] }
  0xa4   : > { %1428 = vrot.lane.b32.xlu1 %v2225_v11, %s2602_s6  ;;  %v1024_v26 = vrot.slane %v1023_v13, 4  ;;  %v1050_v31 = vshll.u32 %v3345_v10, 16  ;;  %v941_v33 = vor.u32 %v940_v40, %v937_v18  ;;  %v944_v25 = vshll.u32 %v3317_v47, 16  ;;  %v3387_v13 = vpop.permute.xlu0 %1240 }
  0xa5   : > { %v928_v34 = vrot.slane %v927_v30, 4  ;;  %v1043_v42 = vsel %vm2823_vm5, %v1038_v44, %v1042_v24  ;;  %v1047_v43 = vor.u32 %v1046_v19, %v1042_v24  ;;  %v950_v41 = vrot.slane %v948_v1, 4 }
  0xa6   : > { %1420 = vrot.lane.b32.xlu0 %v2221_v52, %s2602_s6  ;;  %v1029_v57 = vsel %vm2823_vm5, %v1024_v26, %v1028_v27  ;;  %v1052_v29 = vrot.slane %v1050_v31, 5  ;;  %v942_v55 = vrot.slane %v941_v33, 4  ;;  %v946_v56 = vrot.slane %v944_v25, 5  ;;  %s2605_s6 = smov [#allocation2]  }
  0xa7   : > { %v2232_v11 = vcombine.low %v1019_v48, %v1029_v57  ;;  %v933_v62 = vsel %vm2823_vm5, %v928_v34, %v932_v21  ;;  %v1048_v63 = vrot.slane %v1047_v43, 4  ;;  %v954_v1 = vshll.u32 %v3356_v59, 16 }
  0xa8   : > { %v2228_v18 = vcombine.low %v923_v23, %v933_v62  ;;  %v947_v45 = vsel %vm2823_vm5, %v942_v55, %v946_v56  ;;  %v951_v52 = vor.u32 %v950_v41, %v946_v56  ;;  %v2168_v51 = vrot.slane %v2160_v46, 9 }
  0xa9   : > { %1466 = vrot.lane.b32.xlu1 %v2232_v11, %s2603_s8  ;;  %v1053_v40 = vsel %vm2823_vm5, %v1048_v63, %v1052_v29  ;;  %v956_v22 = vrot.slane %v954_v1, 5  ;;  %v1130_v8 = vrot.slane %v3268_v3, 5  ;;  %v1133_v5 = vrot.slane %v3321_v53, 5  ;;  %v3389_v3 = vpop.permute.xlu1 %1200  ;;  %v2421_v29 = vld [vmem:[%s3667_s1 + $0x8] sm:$0xff]  }
  0xaa   : > { %1458 = vrot.lane.b32.xlu0 %v2228_v18, %s2603_s8  ;;  %v2233_v6 = vcombine.low %v1043_v42, %v1053_v40  ;;  %v952_v27 = vrot.slane %v951_v52, 4  ;;  %v2164_v2 = vrot.slane %v2156_v15, 9  ;;  %v1102_v14 = vrot.slane %v3282_v20, 5  ;;  %v2492_v40 = vld [vmem:[%s2709_s14 + $0x30] sm:$0xf] }
  0xab   : > { %v1131_v17 = vsel %vm2757_vm2, %v2168_v51, %v1130_v8  ;;  %v1132_v9 = vrot.slane %v1130_v8, 4  ;;  %v1105_v12 = vrot.slane %v3332_v7, 5  ;;  %v2169_v48 = vrot.slane %v2161_v54, 9  ;;  %v2491_v54 = vld [vmem:[%s2709_s14 + $0x34] sm:$0xf] }
  0xac   : > { %v957_v53 = vsel %vm2823_vm5, %v952_v27, %v956_v22  ;;  %v1103_v21 = vsel %vm2757_vm2, %v2164_v2, %v1102_v14  ;;  %v1104_v19 = vrot.slane %v1102_v14, 4  ;;  %v1137_v20 = vrot.slane %v3297_v28, 5  ;;  %v2494_v27 = vld [vmem:[%s2709_s14] sm:$0xf] }
  0xad   : > { %1468 = vrot.lane.b32.xlu1 %v2233_v6, %s2603_s8  ;;  %v2229_v23 = vcombine.low %v947_v45, %v957_v53  ;;  %v1134_v7 = vsel %vm2757_vm2, %v1132_v9, %v1133_v5  ;;  %v1140_v30 = vrot.slane %v3345_v10, 5  ;;  %v2165_v44 = vrot.slane %v2157_v16, 9  ;;  %v1199_v41 = vpop.permute.xlu0 %1198  ;;  %v2493_v6 = vld [vmem:[%s2709_s14 + $0x4] sm:$0xf] }
  0xae   : > { %v2240_v24 = vcombine.low %v1131_v17, %v1134_v7  ;;  %v1106_v58 = vsel %vm2757_vm2, %v1104_v19, %v1105_v12  ;;  %v1138_v26 = vsel %vm2757_vm2, %v2169_v48, %v1137_v20  ;;  %v1139_v31 = vrot.slane %v1137_v20, 4 }
  0xaf   : > { %1460 = vrot.lane.b32.xlu0 %v2229_v23, %s2603_s8  ;;  %v2236_v28 = vcombine.low %v1103_v21, %v1106_v58  ;;  %v1109_v33 = vrot.slane %v3317_v47, 5  ;;  %v1112_v25 = vrot.slane %v3356_v59, 5  ;;  %v2420_v59 = vld [vmem:[%s3667_s1 + $0x10] ss:$0 sps:$4 sm:$0x33]   ;;  %v2174_v22 = vcombine.low %v2492_v40, %v2491_v54  ;;  %s202_s8 = sand.u32 1, %s2571_s16  }
  0xb0   : > { %v1141_v34 = vsel %vm2757_vm2, %v1139_v31, %v1140_v30  ;;  %2317 = vmatprep.subr.msk.bf16.mxu0 %vm1691_vm6, %v2420_v59  ;;  %v1693_v11 = vsel %vm1691_vm6, %v2420_v59, 0  ;;  %2318 = vmatprep.subr.msk.bf16.mxu1 %vm1691_vm6, %v2420_v59  ;;  %v2170_v2 = vcombine.low %v2494_v27, %v2493_v6  ;;  %v2496_v23 = vld [vmem:[%s2709_s14 + $0x3c] sm:$0xf]  ;;  %s3614_s30 = scalar_lea.sflag [#allocation3], %s202_s8 }
  0xb1   : > { %1506 = vrot.lane.b32.xlu1 %v2240_v24, %s2604_s9  ;;  %v2241_v10 = vcombine.low %v1138_v26, %v1141_v34  ;;  %v1110_v42 = vsel %vm2757_vm2, %v2165_v44, %v1109_v33  ;;  %v1111_v43 = vrot.slane %v1109_v33, 4  ;;  %v3412_v46 = vpop.permute.xlu1 %1208  ;;  %2290 = vmatpush3.bf16.msra.mxu0 %v1693_v11  ;;  %v2498_v33 = vld [vmem:[%s2709_s14 + $0xc] sm:$0xf] }
  0xb2   : > { %2314 = vmatpush3.bf16.msra.mxu1 %v1693_v11  ;;  %2291 = vmatprep.subr.bf16.mxu0 %v2421_v29  ;;  %v1513_v9 = vsel %vm1510_vm7, %v2170_v2, %v1199_v41 }
  0xb3   : > { %1498 = vrot.lane.b32.xlu0 %v2236_v28, %s2604_s9  ;;  %v1113_v47 = vsel %vm2757_vm2, %v1111_v43, %v1112_v25  ;;  %2312 = vmatprep.subr.bf16.mxu1 %v2421_v29  ;;  %v1537_v21 = vsel %vm1535_vm8, %v1513_v9, %v3362_v50  ;;  %v2497_v28 = vld [vmem:[%s2709_s14 + $0x10] sm:$0xf] }
  0xb4   : > { %v2237_v57 = vcombine.low %v1110_v42, %v1113_v47  ;;  %v1554_v30 = vsel %vm1552_vm9, %v1537_v21, %v3305_v36  ;;  %v2171_v25 = vcombine.low %v2498_v33, %v2497_v28 }
  0xb5   : > { %1508 = vrot.lane.b32.xlu1 %v2241_v10, %s2604_s9  ;;  %2292 = vmatpush3.bf16.msra.mxu0 %v2421_v29 }
  0xb6   : > { %v1335_v55 = vpop.permute.xlu1 %1334  ;;  %2315 = vmatpush3.bf16.msra.mxu1 %v2421_v29  ;;  %2293 = vmatprep.subr.bf16.mxu0 %v2424_v39  ;;  %v1516_v47 = vsel %vm1510_vm7, %v2171_v25, %v3389_v3  ;;  %v2173_v25 = vcombine.low %v3097_v49, %v3105_v37 }
  0xb7   : > { %1500 = vrot.lane.b32.xlu0 %v2237_v57, %s2604_s9  ;;  %v1207_v56 = vpop.permute.xlu0 %1206  ;;  %2313 = vmatprep.subr.bf16.mxu1 %v2424_v39  ;;  %v1539_v57 = vsel %vm1535_vm8, %v1516_v47, %v3387_v13  ;;  %s2073_s9 = sshll.u32 %s202_s8, 7 }
  0xb8   : > { %v1525_v14 = vsel %vm1510_vm7, %v2174_v22, %v1207_v56  ;;  %v1556_v11 = vsel %vm1552_vm9, %v1539_v57, %v3338_v32  ;;  %s3568_s10 = scalar_lea.vmem [#allocation2], %s2073_s9  ;;  %s2507_s9 = sshll.u32 %s2605_s6, 4  ;;  %s2508_s9 = int_to_ptr.vmem [resolvable:$false] %s2507_s9 }
  0xb9   : > { %2294 = vmatpush3.bf16.msra.mxu0 %v2424_v39  ;;  %v1545_v17 = vsel %vm1535_vm8, %v1525_v14, %v3340_v35  ;;  %v2495_v35 = vld [vmem:[%s2709_s14 + $0x40] sm:$0xf]  ;;  %s1982_s19 = sshll.u32 %s3568_s10, 4  ;;  %s2509_s11 = scalar_lea.vmem %s2508_s9, 4096  ;;  %s3608_s19 = int_to_ptr.vmem [resolvable:$true] %s1982_s19 }
  0xba   : > { %2316 = vmatpush3.bf16.msra.mxu1 %v2424_v39  ;;  %v1562_v48 = vsel %vm1552_vm9, %v1545_v17, %v3261_v4  ;;  %v2175_v7 = vcombine.low %v2496_v23, %v2495_v35  ;;  %v2499_v23 = vld [vmem:[%s2709_s14 + $0x48] sm:$0xf]  ;;  %s2503_s5 = scalar_lea.vmem %s3608_s19, 2048  ;;  %p2510_p2 = scmp.lt.s32.totalorder %s3608_s19, %s2508_s9 }
  0xbb   : > { %v1327_v62 = vpop.permute.xlu0 %1326  ;;  %v1579_v20 = vsel %vm1569_vm10, %v1562_v48, %v1335_v55  ;;  %p2504_p13 = scmp.ne.s32.totalorder %s3608_s19, %s2503_s5  ;;  %p2511_p4 = scmp.lt.s32.totalorder %s2509_s11, %s2503_s5 }
  0xbc   : > { %v3428_v63 = vpop.permute.xlu1 %1336  ;;  %v1571_v50 = vsel %vm1569_vm10, %v1554_v30, %v1327_v62  ;;  %v1528_v10 = vsel %vm1510_vm7, %v2175_v7, %v3412_v46  ;;  %v2500_v7 = vld [vmem:[%s2709_s14 + $0x4c] sm:$0xf] }
  0xbd   : > { %v1547_v59 = vsel %vm1535_vm8, %v1528_v10, %v3364_v0  ;;  %v2176_v30 = vcombine.low %v2499_v23, %v2500_v7  ;;  %p2505_p0 = pnand %p2504_p13, %p2683_p3  ;;  %p2512_p5 = por %p2511_p4, %p2510_p2 }
  0xbe   : > { %v1564_v46 = vsel %vm1552_vm9, %v1547_v59, %v3307_v38 }
  0xbf   : > { %v3430_v1 = vpop.permute.xlu0 %1328  ;;  %v1581_v55 = vsel %vm1569_vm10, %v1564_v46, %v3428_v63  ;;  %p2506_p1 = pneg %p2505_p0 }
  0xc0   : > { %v1375_v15 = vpop.permute.xlu1 %1374  ;;  %v1573_v0 = vsel %vm1569_vm10, %v1556_v11, %v3430_v1 }
  0xc1   : > { %v1596_v4 = vsel %vm1586_vm11, %v1579_v20, %v1375_v15  ;;  %p2513_p6 = pnand %p2512_p5, %p2506_p1 }
  0xc3   : > { %v1367_v18 = vpop.permute.xlu0 %1366 }
  0xc4   : > { %v1377_v45 = vpop.permute.xlu1 %1376  ;;  %v1588_v58 = vsel %vm1586_vm11, %v1571_v50, %v1367_v18 }
  0xc5   : > { %v1598_v56 = vsel %vm1586_vm11, %v1581_v55, %v1377_v45 }
  0xc7   : > { %v3432_v52 = vpop.permute.xlu0 %1368 }
  0xc8   : > { %v1423_v51 = vpop.permute.xlu1 %1422  ;;  %v1590_v38 = vsel %vm1586_vm11, %v1573_v0, %v3432_v52 }
  0xc9   : > { %v1613_v24 = vsel %vm1603_vm12, %v1596_v4, %v1423_v51  ;;  %v2501_v4 = vld [vmem:[%s2709_s14 + $0x18] sm:$0xf] }
  0xcb   : > { %v1415_v8 = vpop.permute.xlu0 %1414 }
  0xcc   : > { %v1425_v5 = vpop.permute.xlu1 %1424  ;;  %v1605_v34 = vsel %vm1603_vm12, %v1588_v58, %v1415_v8 }
  0xcd   : > { %v1615_v3 = vsel %vm1603_vm12, %v1598_v56, %v1425_v5 }
  0xcf   : > { %v1417_v16 = vpop.permute.xlu0 %1416 }
  0xd0   : > { %v1607_v63 = vsel %vm1603_vm12, %v1590_v38, %v1417_v16 }
  0xd1   : > { %v1463_v12 = vpop.permute.xlu1 %1462 }
  0xd2   : > { %v1630_v26 = vsel %vm1620_vm13, %v1613_v24, %v1463_v12 }
  0xd3   : > { %v1455_v53 = vpop.permute.xlu0 %1454 }
  0xd4   : > { %v1622_v42 = vsel %vm1620_vm13, %v1605_v34, %v1455_v53 }
  0xd5   : > { %v1465_v19 = vpop.permute.xlu1 %1464 }
  0xd6   : > { %v1632_v13 = vsel %vm1620_vm13, %v1615_v3, %v1465_v19 }
  0xd7   : > { %v1457_v44 = vpop.permute.xlu0 %1456 }
  0xd8   : > { %v1624_v32 = vsel %vm1620_vm13, %v1607_v63, %v1457_v44  ;;  %v2502_v44 = vld [vmem:[%s2709_s14 + $0x1c] sm:$0xf]  ;;  %s3605_s14 = scalar_lea.hbm %s3670_s4, %s2274_s18 }
  0xd9   : > { %v1503_v31 = vpop.permute.xlu1 %1502  ;;  %v2172_v50 = vcombine.low %v2501_v4, %v2502_v44 }
  0xda   : > { %v1647_v36 = vsel %vm1637_vm14, %v1630_v26, %v1503_v31  ;;  %v2177_v31 = vcombine.low %v3075_v60, %v3084_v61 }
  0xdb   : > { %v1495_v43 = vpop.permute.xlu0 %1494  ;;  %2303 = vmatprep.mubr.msk.bf16.mxu1 %vm1674_vm15, %v1647_v36 }
  0xdc   : > { %v1639_v41 = vsel %vm1637_vm14, %v1622_v42, %v1495_v43 }
  0xdd   : > { %2295 = vmatprep.mubr.msk.bf16.mxu0 %vm1674_vm15, %v1639_v41 }
  0xe1   : > { %v1211_v29 = vpop.permute.xlu1 %1210 }
  0xe2   : > { %v1531_v26 = vsel %vm1510_vm7, %v2176_v30, %v1211_v29 }
  0xe4   : > { %v1203_v39 = vpop.permute.xlu0 %1202 }
  0xe5   : > { %v1505_v62 = vpop.permute.xlu1 %1504  ;;  %v1519_v33 = vsel %vm1510_vm7, %v2172_v50, %v1203_v39 }
  0xe6   : > { %v1649_v15 = vsel %vm1637_vm14, %v1632_v13, %v1505_v62 }
  0xe7   : > { %2304 = vmatmul.mubr.msk.bf16.vlgmr.msra.gmra.mxu1 %vm1674_vm15, %v1649_v15 }
  0xe8   : > { %v1497_v18 = vpop.permute.xlu0 %1496 }
  0xe9   : > { %v1641_v45 = vsel %vm1637_vm14, %v1624_v32, %v1497_v18 }
  0xea   : > { %2296 = vmatmul.mubr.msk.bf16.vlgmr.msra.gmra.mxu0 %vm1674_vm15, %v1641_v45 }
  0xed   : > { %v1213_v1 = vpop.permute.xlu1 %1212 }
  0xee   : > { %v1534_v43 = vsel %vm1510_vm7, %v2177_v31, %v1213_v1 }
  0xf0   : > { %v1205_v51 = vpop.permute.xlu0 %1204 }
  0xf1   : > { %v1251_v54 = vpop.permute.xlu1 %1250  ;;  %v1522_v37 = vsel %vm1510_vm7, %v2173_v25, %v1205_v51 }
  0xf2   : > { %v1549_v28 = vsel %vm1535_vm8, %v1531_v26, %v1251_v54 }
  0xf4   : > { %v1243_v40 = vpop.permute.xlu0 %1242 }
  0xf5   : > { %v1253_v22 = vpop.permute.xlu1 %1252  ;;  %v1541_v10 = vsel %vm1535_vm8, %v1519_v33, %v1243_v40 }
  0xf6   : > { %v1551_v47 = vsel %vm1535_vm8, %v1534_v43, %v1253_v22 }
  0xf8   : > { %v1245_v8 = vpop.permute.xlu0 %1244 }
  0xf9   : > { %v1299_v52 = vpop.permute.xlu1 %1298  ;;  %v1543_v56 = vsel %vm1535_vm8, %v1522_v37, %v1245_v8 }
  0xfa   : > { %v1566_v34 = vsel %vm1552_vm9, %v1549_v28, %v1299_v52  ;;  %v3538_v52 = vld [vmem:[%s3668_s2] ss:$0 sm:$0xff] }
  0xfc   : > { %v1291_v5 = vpop.permute.xlu0 %1290 }
  0xfd   : > { %v1301_v6 = vpop.permute.xlu1 %1300  ;;  %v1558_v41 = vsel %vm1552_vm9, %v1541_v10, %v1291_v5  ;;  %v3543_v5 = vld [vmem:[%s3669_s3] ss:$0 sm:$0xff] }
  0xfe   : > { %v1568_v57 = vsel %vm1552_vm9, %v1551_v47, %v1301_v6 }
 0x100   : > { %v1293_v27 = vpop.permute.xlu0 %1292 }
 0x101   : > { %v1560_v0 = vsel %vm1552_vm9, %v1543_v56, %v1293_v27 }
 0x102   : > { %v1339_v2 = vpop.permute.xlu1 %1338 }
 0x103   : > { %v1583_v42 = vsel %vm1569_vm10, %v1566_v34, %v1339_v2 }
 0x104   : > { %v1331_v14 = vpop.permute.xlu0 %1330 }
 0x105   : > { %v1575_v59 = vsel %vm1569_vm10, %v1558_v41, %v1331_v14 }
 0x106   : > { %v1341_v16 = vpop.permute.xlu1 %1340 }
 0x107   : > { %v1585_v11 = vsel %vm1569_vm10, %v1568_v57, %v1341_v16 }
 0x108   : > { %v1333_v17 = vpop.permute.xlu0 %1332 }
 0x109   : > { %v1577_v15 = vsel %vm1569_vm10, %v1560_v0, %v1333_v17 }
 0x10a   : > { %v1379_v9 = vpop.permute.xlu1 %1378 }
 0x10b   : > { %v1600_v60 = vsel %vm1586_vm11, %v1583_v42, %v1379_v9 }
 0x10c   : > { %v1371_v12 = vpop.permute.xlu0 %1370 }
 0x10d   : > { %v1592_v46 = vsel %vm1586_vm11, %v1575_v59, %v1371_v12 }
 0x10e   : > { %v1381_v48 = vpop.permute.xlu1 %1380 }
 0x10f   : > { %v1602_v13 = vsel %vm1586_vm11, %v1585_v11, %v1381_v48 }
 0x110   : > { %v1373_v53 = vpop.permute.xlu0 %1372 }
 0x111   : > { %v1594_v18 = vsel %vm1586_vm11, %v1577_v15, %v1373_v53 }
 0x112   : > { %v1427_v21 = vpop.permute.xlu1 %1426 }
 0x113   : > { %v1617_v49 = vsel %vm1603_vm12, %v1600_v60, %v1427_v21 }
 0x114   : > { %v1419_v19 = vpop.permute.xlu0 %1418 }
 0x115   : > { %v1609_v3 = vsel %vm1603_vm12, %v1592_v46, %v1419_v19 }
 0x116   : > { %v1429_v20 = vpop.permute.xlu1 %1428 }
 0x117   : > { %v1619_v63 = vsel %vm1603_vm12, %v1602_v13, %v1429_v20 }
 0x118   : > { %v1421_v35 = vpop.permute.xlu0 %1420 }
 0x119   : > { %v1611_v51 = vsel %vm1603_vm12, %v1594_v18, %v1421_v35 }
 0x11b   : > { %v1467_v24 = vpop.permute.xlu1 %1466 }
 0x11c   : > { %v1459_v58 = vpop.permute.xlu0 %1458  ;;  %v1634_v29 = vsel %vm1620_vm13, %v1617_v49, %v1467_v24 }
 0x11d   : > { %v1626_v62 = vsel %vm1620_vm13, %v1609_v3, %v1459_v58 }
 0x11f   : > { %v1469_v36 = vpop.permute.xlu1 %1468 }
 0x120   : > { %v1636_v45 = vsel %vm1620_vm13, %v1619_v63, %v1469_v36 }
 0x121   : > { %v1461_v61 = vpop.permute.xlu0 %1460 }
 0x122   : > { %v1628_v40 = vsel %vm1620_vm13, %v1611_v51, %v1461_v61 }
 0x123   : > { %v1507_v55 = vpop.permute.xlu1 %1506 }
 0x124   : > { %v1651_v39 = vsel %vm1637_vm14, %v1634_v29, %v1507_v55 }
 0x125   : > { %v1499_v38 = vpop.permute.xlu0 %1498  ;;  %2307 = vmatprep.mubr.msk.bf16.mxu1 %vm1674_vm15, %v1651_v39 }
 0x126   : > { %v1643_v32 = vsel %vm1637_vm14, %v1626_v62, %v1499_v38 }
 0x127   : > { %2299 = vmatprep.mubr.msk.bf16.mxu0 %vm1674_vm15, %v1643_v32  ;;  %v1509_v1 = vpop.permute.xlu1 %1508 }
 0x128   : > { %v1653_v54 = vsel %vm1637_vm14, %v1636_v45, %v1509_v1 }
 0x129   : > { %v1501_v22 = vpop.permute.xlu0 %1500  ;;  %2308 = vmatmul.mubr.msk.bf16.gmra.mxu1 %vm1674_vm15, %v1653_v54 }
 0x12a   : > { %v1645_v8 = vsel %vm1637_vm14, %v1628_v40, %v1501_v22 }
 0x12b   : > { %2300 = vmatmul.mubr.msk.bf16.gmra.mxu0 %vm1674_vm15, %v1645_v8 }
 0x1a7   : > { %v2305_v6 = vpop.f32.mrf.mxu1 }
 0x1a8   : > { %v1809_v27 = vmul.f32 %v2305_v6, %v3538_v52 }
 0x1a9   : > { %v1761_v2 = vpop.f32.mrf.mxu1 }
 0x1aa   : > { %v2297_v14 = vpop.f32.mrf.mxu0  ;;  %v3547_v16 = vadd.f32 %v3543_v5, %v1809_v27  ;;  %v1807_v17 = vmul.f32 %v3538_v52, %v1761_v2 }
 0x1ab   : > { %v1801_v9 = vmul.f32 %v2297_v14, %v3538_v52  ;;  %v2306_v12 = vpop.f32.mrf.mxu1 }
 0x1ac   : > { %v2265_v48 = vmul.f32 -1.442695, %v3547_v16  ;;  %v1729_v53 = vpop.f32.mrf.mxu0  ;;  %v1830_v21 = vadd.f32 %v3543_v5, %v1807_v17  ;;  %v1810_v19 = vmul.f32 %v2306_v12, %v3538_v52 }
 0x1ad   : > { %v1824_v20 = vadd.f32 %v3543_v5, %v1801_v9  ;;  %v1799_v35 = vmul.f32 %v3538_v52, %v1729_v53  ;;  %v1764_v23 = vpop.f32.mrf.mxu1 }
 0x1ae   : > { %2427 = vpow2.f32 %v2265_v48  ;;  %v2263_v7 = vmul.f32 -1.442695, %v1830_v21  ;;  %v2298_v30 = vpop.f32.mrf.mxu0  ;;  %v1833_v4 = vadd.f32 %v3543_v5, %v1810_v19  ;;  %v1808_v44 = vmul.f32 %v3538_v52, %v1764_v23 }
 0x1af   : > { %v2257_v50 = vmul.f32 -1.442695, %v1824_v20  ;;  %v1822_v24 = vadd.f32 %v3543_v5, %v1799_v35  ;;  %v1802_v58 = vmul.f32 %v2298_v30, %v3538_v52 }
 0x1b0   : > { %2429 = vpow2.f32 %v2263_v7  ;;  %v2266_v26 = vmul.f32 -1.442695, %v1833_v4  ;;  %v1732_v31 = vpop.f32.mrf.mxu0  ;;  %v1831_v28 = vadd.f32 %v3543_v5, %v1808_v44 }
 0x1b1   : > { %2431 = vpow2.f32 %v2257_v50  ;;  %v2255_v33 = vmul.f32 -1.442695, %v1822_v24  ;;  %v1825_v25 = vadd.f32 %v3543_v5, %v1802_v58  ;;  %v1800_v34 = vmul.f32 %v3538_v52, %v1732_v31 }
 0x1b2   : > { %2433 = vpow2.f32 %v2266_v26  ;;  %v2264_v36 = vmul.f32 -1.442695, %v1831_v28 }
 0x1b3   : > { %2435 = vpow2.f32 %v2255_v33  ;;  %v2258_v10 = vmul.f32 -1.442695, %v1825_v25  ;;  %v1823_v42 = vadd.f32 %v3543_v5, %v1800_v34 }
 0x1b4   : > { %2437 = vpow2.f32 %v2264_v36 }
 0x1b5   : > { %2439 = vpow2.f32 %v2258_v10  ;;  %v2256_v43 = vmul.f32 -1.442695, %v1823_v42 }
 0x1b7   : > { %2441 = vpow2.f32 %v2256_v43 }
 0x1bb   : > { %v2428_v41 = vpop.eup %2427 }
 0x1bc   : > { %v1896_v60 = vadd.f32 1.0, %v2428_v41 }
 0x1bd   : > { %v2430_v61 = vpop.eup %2429 }
 0x1be   : > { %v2432_v47 = vpop.eup %2431  ;;  %2443 = vrcp.f32 %v1896_v60  ;;  %v1894_v59 = vadd.f32 1.0, %v2430_v61 }
 0x1bf   : > { %v2434_v49 = vpop.eup %2433  ;;  %v1888_v37 = vadd.f32 1.0, %v2432_v47 }
 0x1c0   : > { %v2436_v57 = vpop.eup %2435  ;;  %2445 = vrcp.f32 %v1894_v59  ;;  %v1897_v46 = vadd.f32 1.0, %v2434_v49 }
 0x1c1   : > { %v2438_v29 = vpop.eup %2437  ;;  %2447 = vrcp.f32 %v1888_v37  ;;  %v1886_v55 = vadd.f32 1.0, %v2436_v57 }
 0x1c2   : > { %v2440_v56 = vpop.eup %2439  ;;  %2449 = vrcp.f32 %v1897_v46  ;;  %v1895_v11 = vadd.f32 1.0, %v2438_v29 }
 0x1c3   : > { %2451 = vrcp.f32 %v1886_v55  ;;  %v1889_v3 = vadd.f32 1.0, %v2440_v56 }
 0x1c4   : > { %v2442_v39 = vpop.eup %2441  ;;  %2453 = vrcp.f32 %v1895_v11 }
 0x1c5   : > { %2455 = vrcp.f32 %v1889_v3  ;;  %v1887_v0 = vadd.f32 1.0, %v2442_v39 }
 0x1c7   : > { %2457 = vrcp.f32 %v1887_v0 }
 0x1cb   : > { %v2444_v13 = vpop.eup %2443 }
 0x1cc   : > { %v1944_v62 = vmul.f32 %v2444_v13, %v3547_v16 }
 0x1cd   : > { %v2446_v38 = vpop.eup %2445 }
 0x1ce   : > { %v2448_v15 = vpop.eup %2447  ;;  %1960 = vst [vmem:[%s3568_s10 + $0x50] sm:$0xff] %v1944_v62  ;;  %v1942_v63 = vmul.f32 %v2446_v38, %v1830_v21 }
 0x1cf   : > { %v2450_v32 = vpop.eup %2449  ;;  %v1936_v18 = vmul.f32 %v2448_v15, %v1824_v20 }
 0x1d0   : > { %v2452_v45 = vpop.eup %2451  ;;  %1958 = vst [vmem:[%s3568_s10 + $0x40] sm:$0xff] %v1942_v63  ;;  %v1945_v1 = vmul.f32 %v2450_v32, %v1833_v4 }
 0x1d1   : > { %v2454_v51 = vpop.eup %2453  ;;  %1952 = vst [vmem:[%s3568_s10 + $0x10] sm:$0xff] %v1936_v18  ;;  %v1934_v54 = vmul.f32 %v2452_v45, %v1822_v24 }
 0x1d2   : > { %v2456_v40 = vpop.eup %2455  ;;  %1961 = vst [vmem:[%s3568_s10 + $0x58] sm:$0xff] %v1945_v1  ;;  %v1943_v22 = vmul.f32 %v2454_v51, %v1831_v28 }
 0x1d3   : > { %1950 = vst [vmem:[%s3568_s10] sm:$0xff] %v1934_v54  ;;  %v1937_v8 = vmul.f32 %v2456_v40, %v1825_v25 }
 0x1d4   : > { %v2458_v6 = vpop.eup %2457  ;;  %1959 = vst [vmem:[%s3568_s10 + $0x48] sm:$0xff] %v1943_v22 }
 0x1d5   : > { %1953 = vst [vmem:[%s3568_s10 + $0x18] sm:$0xff] %v1937_v8  ;;  %v1935_v27 = vmul.f32 %v2458_v6, %v1823_v42 }
 0x1d7   : > { %1951 = vst [vmem:[%s3568_s10 + $0x8] sm:$0xff] %v1935_v27 }
 0x1e9   : > { %v2309_v2 = vpop.f32.mrf.mxu1 }
 0x1ea   : > { %v1813_v14 = vmul.f32 %v2309_v2, %v3538_v52 }
 0x1eb   : > { %v2301_v16 = vpop.f32.mrf.mxu0  ;;  %v1777_v17 = vpop.f32.mrf.mxu1 }
 0x1ec   : > { %v1805_v9 = vmul.f32 %v2301_v16, %v3538_v52  ;;  %v1836_v12 = vadd.f32 %v3543_v5, %v1813_v14  ;;  %v1811_v48 = vmul.f32 %v3538_v52, %v1777_v17 }
 0x1ed   : > { %v1745_v53 = vpop.f32.mrf.mxu0  ;;  %v2310_v21 = vpop.f32.mrf.mxu1 }
 0x1ee   : > { %v1828_v19 = vadd.f32 %v3543_v5, %v1805_v9  ;;  %v2269_v20 = vmul.f32 -1.442695, %v1836_v12  ;;  %v1803_v35 = vmul.f32 %v3538_v52, %v1745_v53  ;;  %v1834_v23 = vadd.f32 %v3543_v5, %v1811_v48 }
 0x1ef   : > { %v2302_v7 = vpop.f32.mrf.mxu0  ;;  %v1814_v30 = vmul.f32 %v2310_v21, %v3538_v52  ;;  %v1780_v4 = vpop.f32.mrf.mxu1 }
 0x1f0   : > { %v2261_v44 = vmul.f32 -1.442695, %v1828_v19  ;;  %2459 = vpow2.f32 %v2269_v20  ;;  %v1826_v50 = vadd.f32 %v3543_v5, %v1803_v35  ;;  %v2267_v24 = vmul.f32 -1.442695, %v1834_v23 }
 0x1f1   : > { %v1806_v58 = vmul.f32 %v2302_v7, %v3538_v52  ;;  %v1837_v26 = vadd.f32 %v3543_v5, %v1814_v30  ;;  %v1748_v31 = vpop.f32.mrf.mxu0  ;;  %v1812_v28 = vmul.f32 %v3538_v52, %v1780_v4 }
 0x1f2   : > { %2461 = vpow2.f32 %v2261_v44  ;;  %v2259_v33 = vmul.f32 -1.442695, %v1826_v50  ;;  %v1804_v25 = vmul.f32 %v3538_v52, %v1748_v31 }
 0x1f3   : > { %2463 = vpow2.f32 %v2267_v24  ;;  %v1829_v34 = vadd.f32 %v3543_v5, %v1806_v58  ;;  %v2270_v36 = vmul.f32 -1.442695, %v1837_v26  ;;  %v1835_v10 = vadd.f32 %v3543_v5, %v1812_v28 }
 0x1f4   : > { %2465 = vpow2.f32 %v2259_v33  ;;  %v1827_v42 = vadd.f32 %v3543_v5, %v1804_v25 }
 0x1f5   : > { %v2262_v43 = vmul.f32 -1.442695, %v1829_v34  ;;  %2467 = vpow2.f32 %v2270_v36  ;;  %v2268_v41 = vmul.f32 -1.442695, %v1835_v10 }
 0x1f6   : > { %v2260_v60 = vmul.f32 -1.442695, %v1827_v42 }
 0x1f7   : > { %2469 = vpow2.f32 %v2262_v43 }
 0x1f8   : > { %2471 = vpow2.f32 %v2260_v60 }
 0x1f9   : > { %2473 = vpow2.f32 %v2268_v41 }
 0x1fd   : > { %v2460_v61 = vpop.eup %2459 }
 0x1fe   : > { %v1900_v47 = vadd.f32 1.0, %v2460_v61 }
 0x1ff   : > { %v2462_v59 = vpop.eup %2461 }
 0x200   : > { %v2464_v52 = vpop.eup %2463  ;;  %v1892_v49 = vadd.f32 1.0, %v2462_v59  ;;  %2475 = vrcp.f32 %v1900_v47 }
 0x201   : > { %v2466_v37 = vpop.eup %2465  ;;  %v1898_v57 = vadd.f32 1.0, %v2464_v52 }
 0x202   : > { %v2468_v46 = vpop.eup %2467  ;;  %2477 = vrcp.f32 %v1892_v49  ;;  %v1890_v29 = vadd.f32 1.0, %v2466_v37 }
 0x203   : > { %2479 = vrcp.f32 %v1898_v57  ;;  %v1901_v5 = vadd.f32 1.0, %v2468_v46 }
 0x204   : > { %v2470_v55 = vpop.eup %2469  ;;  %2481 = vrcp.f32 %v1890_v29 }
 0x205   : > { %v2472_v56 = vpop.eup %2471  ;;  %v1893_v11 = vadd.f32 1.0, %v2470_v55  ;;  %2483 = vrcp.f32 %v1901_v5 }
 0x206   : > { %v2474_v3 = vpop.eup %2473  ;;  %v1891_v39 = vadd.f32 1.0, %v2472_v56 }
 0x207   : > { %2485 = vrcp.f32 %v1893_v11  ;;  %v1899_v0 = vadd.f32 1.0, %v2474_v3 }
 0x208   : > { %2487 = vrcp.f32 %v1891_v39 }
 0x209   : > { %2489 = vrcp.f32 %v1899_v0 }
 0x20d   : > { %v2476_v13 = vpop.eup %2475 }
 0x20e   : > { %v1948_v62 = vmul.f32 %v2476_v13, %v1836_v12 }
 0x20f   : > { %v2478_v38 = vpop.eup %2477 }
 0x210   : > { %v2480_v15 = vpop.eup %2479  ;;  %v1940_v63 = vmul.f32 %v2478_v38, %v1828_v19  ;;  %1964 = vst [vmem:[%s3568_s10 + $0x70] sm:$0xff] %v1948_v62 }
 0x211   : > { %v2482_v32 = vpop.eup %2481  ;;  %v1946_v18 = vmul.f32 %v2480_v15, %v1834_v23 }
 0x212   : > { %v2484_v45 = vpop.eup %2483  ;;  %1956 = vst [vmem:[%s3568_s10 + $0x30] sm:$0xff] %v1940_v63  ;;  %v1938_v1 = vmul.f32 %v2482_v32, %v1826_v50 }
 0x213   : > { %1962 = vst [vmem:[%s3568_s10 + $0x60] sm:$0xff] %v1946_v18  ;;  %v1949_v51 = vmul.f32 %v2484_v45, %v1837_v26 }
 0x214   : > { %v2486_v54 = vpop.eup %2485  ;;  %1954 = vst [vmem:[%s3568_s10 + $0x20] sm:$0xff] %v1938_v1 }
 0x215   : > { %v2488_v40 = vpop.eup %2487  ;;  %v1941_v22 = vmul.f32 %v2486_v54, %v1829_v34  ;;  %1965 = vst [vmem:[%s3568_s10 + $0x78] sm:$0xff] %v1949_v51 }
 0x216   : > { %v2490_v8 = vpop.eup %2489  ;;  %v1939_v6 = vmul.f32 %v2488_v40, %v1827_v42 }
 0x217   : > { %1957 = vst [vmem:[%s3568_s10 + $0x38] sm:$0xff] %v1941_v22  ;;  %v1947_v27 = vmul.f32 %v2490_v8, %v1835_v10 }
 0x218   : > { %1955 = vst [vmem:[%s3568_s10 + $0x28] sm:$0xff] %v1939_v6 }
 0x219   : > { %1963 = vst [vmem:[%s3568_s10 + $0x68] sm:$0xff] %v1947_v27 }
 0x21a   : > { %2516 = shalt.err (!%p2513_p6)
}
 0x21b   : > { %s2517_s8 = scalar_lea.hbm %s3605_s14, 2048  ;;  %s2521_s13 = scalar_lea.hbm %s3670_s4, 8192 }
 0x21c   : > { %p2518_p7 = scmp.ne.s32.totalorder %s3605_s14, %s2517_s8  ;;  %p2522_p11 = scmp.lt.s32.totalorder %s3605_s14, %s3670_s4 }
 0x21d   : > { %p2523_p12 = scmp.lt.s32.totalorder %s2521_s13, %s2517_s8 }
 0x21e   : > { %p2519_p9 = pnand %p2518_p7, %p2683_p3 }
 0x21f   : > { %p2524_p13 = por %p2523_p12, %p2522_p11 }
 0x220   : > { %p2520_p10 = pneg %p2519_p9 }
 0x222   : > { %p2525_p0 = pnand %p2524_p13, %p2520_p10 }
 0x224   : > { %2528 = shalt.err (!%p2525_p0)
}
 0x225   : > { %s2606_s27 = smov 128  }
 0x226   : > { %2320 = dma.vmem_to_hbm [thread:$0]  (%p2683_p3), %s3608_s19, 2048, %s3605_s14, %s3614_s30, %s2606_s27, %s2606_s27, %s2598_s24  }
 0x227 PF: > { %p2326_p1 = scmp.ge.s32.totalorder %s2595_s22, 2  ;;  %s1997_s5 = sand.u32 1, %s2567_s15  }
 0x228   : > { %s1998_s6 = scalar_lea.sflag [#allocation3], %s1997_s5 }
 0x229   : > { %p2323_p2 = pnand %p2326_p1, %p2692_p8 }
 0x22b   : > { %p2324_p4 = pneg %p2323_p2 }
 0x22d   : > { %2562 = dma.done.wait (%p2324_p4), %s1998_s6, 2048  }
 0x22e   : > { %2564 = vsyncadd (%p2324_p4), %s1998_s6, 4294965248  ;;  %s17_s22 = sadd.s32 1, %s2595_s22   ;;  %s3677_s15 = smov %s2571_s16 }
 0x22f   : > { %p14_p5 = scmp.ge.s32.totalorder %s17_s22, 6   ;;  %s3678_s16 = smov %s2575_s17 }
 0x230   : > { %s3679_s17 = smov %s2701_s7  ;;  %s3680_s18 = smov %s2587_s20 }
 0x231   : > { %s3681_s19 = smov %s2591_s21  ;;  %s3682_s20 = smov %s3685_s25 }
 0x232   : > { %s3683_s21 = smov %s3689_s26  ;;  %16 = sbr.rel (!%p14_p5) target bundleno = 5 (0x5), region = 74 }
 0x237   :  { %2003 = vsyncpa [#allocation3], 1 }
 0x238   :  { %2005 = vsyncpa [#allocation3 + $0x1], 1 }

</bundles_post_ra>
